<compile_context>
chip_gen: v5e
topology: v5e:2x2
jax: 0.10.0
libtpu: 0.0.40
codegen_flags: <defaults>
</compile_context>

<pallas_src>
import jax
import jax.numpy as jnp
from jax.experimental import pallas as pl
from jax.experimental.pallas import tpu as pltpu


def _lane_layer_kernel(x_ref, w_ref, b_ref, g_ref, bt_ref, cat_ref, lane_ref):
    # x_ref:   (TL, P, D)    TL lanes' points
    # w_ref:   (D, D)        Linear weight, transposed to (in, out)
    # b_ref:   (1, D)        Linear bias
    # g_ref:   (1, D)        LayerNorm gamma
    # bt_ref:  (1, D)        LayerNorm beta
    # cat_ref: (TL, P, 2D)   concat(state, pooled) output
    # lane_ref:(TL, D)       per-lane max-pooled MLP output
    TL, P, D = x_ref.shape
    x = x_ref[...]                                           # (TL, P, D)
    x2 = x.reshape(TL * P, D)

    # --- MLP: Linear -> LayerNorm -> ReLU (single big MXU matmul, f32 math) ---
    h = jnp.dot(x2, w_ref[...], preferred_element_type=jnp.float32)
    h = h + b_ref[...].astype(jnp.float32)                   # (TL*P, D)

    mean = jnp.mean(h, axis=-1, keepdims=True)
    var = jnp.mean(jnp.square(h - mean), axis=-1, keepdims=True)
    hn = (h - mean) * jax.lax.rsqrt(var + 1e-5)              # torch LN: biased var, eps=1e-5
    hn = hn * g_ref[...].astype(jnp.float32) + bt_ref[...].astype(jnp.float32)
    hr = jnp.maximum(hn, 0.0)                                # ReLU, (TL*P, D)

    # --- point_to_lane: fn.max over each lane's points ---
    pool = jnp.max(hr.reshape(TL, P, D), axis=1)             # (TL, D)
    lane_ref[...] = pool.astype(lane_ref.dtype)

    # --- lane_to_point (copy+sum, one lane per point) + concat(state, pooling).
    #     Two slice stores: avoids the jnp.concatenate relayout copy in VMEM.
    cat_ref[:, :, 0:D] = x.astype(cat_ref.dtype)
    cat_ref[:, :, D:2 * D] = jnp.broadcast_to(
        pool[:, None, :], (TL, P, D)
    ).astype(cat_ref.dtype)


def lane_layer(x, weight, bias, ln_gamma, ln_beta, *, lanes_per_block=32):
    """x: [L, P, D] lane_point feats.  weight: [D, D] (torch Linear layout, out x in)."""
    L, P, D = x.shape

    # Lanes-per-block: whole problem if small, else a multiple of 8 (sublane rule).
    if L <= lanes_per_block:
        TL = L
    else:
        TL = lanes_per_block
        assert TL % 8 == 0, "lanes_per_block must be a multiple of 8"

    # Pad the lane axis to a multiple of TL; padded lanes are discarded afterwards.
    Lp = ((L + TL - 1) // TL) * TL
    if Lp != L:
        x_pad = jnp.concatenate(
            [x, jnp.zeros((Lp - L, P, D), dtype=x.dtype)], axis=0
        )
    else:
        x_pad = x

    w_t = weight.T                                # (in, out) so the kernel does x @ w_t
    b2 = bias.reshape(1, D)
    g2 = ln_gamma.reshape(1, D)
    bt2 = ln_beta.reshape(1, D)

    elt = jnp.dtype(x.dtype).itemsize
    cost = pl.CostEstimate(
        flops=2 * Lp * P * D * D,
        transcendentals=Lp * P,                   # one rsqrt per LayerNorm row
        bytes_accessed=elt * (Lp * P * D            # read x
                              + Lp * P * 2 * D      # write concat
                              + Lp * D              # write lane_feats
                              + D * D + 3 * D),     # resident params
    )

    cat_out, lane_out = pl.pallas_call(
        _lane_layer_kernel,
        out_shape=(
            jax.ShapeDtypeStruct((Lp, P, 2 * D), x.dtype),   # lane_point_feats
            jax.ShapeDtypeStruct((Lp, D), x.dtype),          # lane_feats
        ),
        grid_spec=pltpu.PrefetchScalarGridSpec(
            num_scalar_prefetch=0,
            grid=(Lp // TL,),
            in_specs=[
                pl.BlockSpec((TL, P, D), lambda i: (i, 0, 0)),  # x (TL lanes)
                pl.BlockSpec((D, D), lambda i: (0, 0)),         # W^T (resident)
                pl.BlockSpec((1, D), lambda i: (0, 0)),         # bias
                pl.BlockSpec((1, D), lambda i: (0, 0)),         # gamma
                pl.BlockSpec((1, D), lambda i: (0, 0)),         # beta
            ],
            out_specs=[
                pl.BlockSpec((TL, P, 2 * D), lambda i: (i, 0, 0)),
                pl.BlockSpec((TL, D), lambda i: (i, 0)),
            ],
        ),
        compiler_params=pltpu.CompilerParams(
            dimension_semantics=("parallel",),    # lane-tile axis shards across cores
        ),
        cost_estimate=cost,
    )(x_pad, w_t, b2, g2, bt2)

    return {
        "lane_point_feats": cat_out[:L],          # [L, P, 2D]
        "lane_feats": lane_out[:L],               # [L, D]
    }


def _reference(x, weight, bias, ln_gamma, ln_beta):
    h = jnp.einsum("lpd,od->lpo", x, weight) + bias
    mean = jnp.mean(h, axis=-1, keepdims=True)
    var = jnp.mean(jnp.square(h - mean), axis=-1, keepdims=True)
    hn = (h - mean) / jnp.sqrt(var + 1e-5) * ln_gamma + ln_beta
    hr = jnp.maximum(hn, 0.0)
    pool = jnp.max(hr, axis=1)                               # [L, D]
    cat = jnp.concatenate(
        [x, jnp.broadcast_to(pool[:, None, :], x.shape)], axis=-1
    )
    return {"lane_point_feats": cat, "lane_feats": pool}


if __name__ == "__main__":
    # lanes, points-per-lane, feature size (input_size).  L=50 is not a multiple
    # of the 32-lane block, exercising the padding path; TL*P = 256 per step.
    L, P, D = 50, 8, 32
    key = jax.random.PRNGKey(0)
    kx, kw, kb = jax.random.split(key, 3)

    x = jax.random.normal(kx, (L, P, D), dtype=jnp.float32)
    weight = jax.random.normal(kw, (D, D), dtype=jnp.float32) * 0.1   # nn.Linear weight (out, in)
    bias = jax.random.normal(kb, (D,), dtype=jnp.float32) * 0.01
    ln_gamma = jnp.ones((D,), dtype=jnp.float32)
    ln_beta = jnp.zeros((D,), dtype=jnp.float32)

    out = lane_layer(x, weight, bias, ln_gamma, ln_beta)
    jax.block_until_ready(out)

    ref = _reference(x, weight, bias, ln_gamma, ln_beta)
    assert out["lane_point_feats"].shape == (L, P, 2 * D)
    assert out["lane_feats"].shape == (L, D)
    assert jnp.allclose(out["lane_point_feats"], ref["lane_point_feats"], atol=3e-5)
    assert jnp.allclose(out["lane_feats"], ref["lane_feats"], atol=3e-5)

    # Also check the small-L path (single block, TL == L).
    out_small = lane_layer(x[:4], weight, bias, ln_gamma, ln_beta)
    jax.block_until_ready(out_small)
    ref_small = _reference(x[:4], weight, bias, ln_gamma, ln_beta)
    assert jnp.allclose(out_small["lane_feats"], ref_small["lane_feats"], atol=3e-5)
    assert jnp.allclose(out_small["lane_point_feats"],
                        ref_small["lane_point_feats"], atol=3e-5)

    print("KERNEL_OK")
</pallas_src>

<mosaic_0001>
module attributes {stable_mosaic.version = 11 : i64} {
  func.func @_lane_layer_kernel(%arg0: i32, %arg1: memref<32x8x32xf32, #tpu.memory_space<vmem>>, %arg2: memref<32x32xf32, #tpu.memory_space<vmem>>, %arg3: memref<1x32xf32, #tpu.memory_space<vmem>>, %arg4: memref<1x32xf32, #tpu.memory_space<vmem>>, %arg5: memref<1x32xf32, #tpu.memory_space<vmem>>, %arg6: memref<32x8x64xf32, #tpu.memory_space<vmem>>, %arg7: memref<32x32xf32, #tpu.memory_space<vmem>>) attributes {dimension_semantics = [#tpu.dimension_semantics<parallel>], iteration_bounds = array<i64: 2>, scalar_prefetch = 0 : i64, scratch_operands = 0 : i64, tpu.core_type = #tpu.core_type<tc>, window_params = [{transform_indices = @transform_0, window_bounds = array<i64: 32, 8, 32>}, {pipeline_mode = #tpu.pipeline_mode<synchronous>, transform_indices = @transform_1, window_bounds = array<i64: 32, 32>}, {pipeline_mode = #tpu.pipeline_mode<synchronous>, transform_indices = @transform_2, window_bounds = array<i64: 1, 32>}, {pipeline_mode = #tpu.pipeline_mode<synchronous>, transform_indices = @transform_3, window_bounds = array<i64: 1, 32>}, {pipeline_mode = #tpu.pipeline_mode<synchronous>, transform_indices = @transform_4, window_bounds = array<i64: 1, 32>}, {transform_indices = @transform_5, window_bounds = array<i64: 32, 8, 64>}, {transform_indices = @transform_6, window_bounds = array<i64: 32, 32>}]} {
    %c0 = arith.constant 0 : index
    %c0_0 = arith.constant 0 : index
    %c0_1 = arith.constant 0 : index
    %0 = vector.load %arg1[%c0, %c0_0, %c0_1] : memref<32x8x32xf32, #tpu.memory_space<vmem>>, vector<32x8x32xf32>
    %1 = vector.shape_cast %0 : vector<32x8x32xf32> to vector<256x32xf32>
    %c0_2 = arith.constant 0 : index
    %c0_3 = arith.constant 0 : index
    %2 = vector.load %arg2[%c0_2, %c0_3] : memref<32x32xf32, #tpu.memory_space<vmem>>, vector<32x32xf32>
    %cst = arith.constant dense<0.000000e+00> : vector<256x32xf32>
    %3 = tpu.matmul %1, %2, %cst {dimension_numbers = #tpu.dot_dimension_numbers<[1], [0], [0], [1], [0, 0, 1, 1], [], []>} : vector<256x32xf32>, vector<32x32xf32>, vector<256x32xf32> -> vector<256x32xf32>
    %c0_4 = arith.constant 0 : index
    %c0_5 = arith.constant 0 : index
    %4 = vector.load %arg3[%c0_4, %c0_5] : memref<1x32xf32, #tpu.memory_space<vmem>>, vector<1x32xf32>
    %5 = vector.broadcast %4 : vector<1x32xf32> to vector<256x32xf32>
    %6 = arith.addf %3, %5 : vector<256x32xf32>
    %cst_6 = arith.constant dense<0.000000e+00> : vector<256xf32>
    %7 = vector.multi_reduction <add>, %6, %cst_6 [1] : vector<256x32xf32> to vector<256xf32>
    %8 = vector.shape_cast %7 : vector<256xf32> to vector<256x1xf32>
    %cst_7 = arith.constant 3.200000e+01 : f32
    %9 = vector.broadcast %cst_7 : f32 to vector<256x1xf32>
    %10 = arith.divf %8, %9 : vector<256x1xf32>
    %11 = vector.broadcast %10 : vector<256x1xf32> to vector<256x32xf32>
    %12 = arith.subf %6, %11 : vector<256x32xf32>
    %13 = arith.mulf %12, %12 : vector<256x32xf32>
    %cst_8 = arith.constant dense<0.000000e+00> : vector<256xf32>
    %14 = vector.multi_reduction <add>, %13, %cst_8 [1] : vector<256x32xf32> to vector<256xf32>
    %15 = vector.shape_cast %14 : vector<256xf32> to vector<256x1xf32>
    %cst_9 = arith.constant 3.200000e+01 : f32
    %16 = vector.broadcast %cst_9 : f32 to vector<256x1xf32>
    %17 = arith.divf %15, %16 : vector<256x1xf32>
    %18 = vector.broadcast %10 : vector<256x1xf32> to vector<256x32xf32>
    %19 = arith.subf %6, %18 : vector<256x32xf32>
    %cst_10 = arith.constant 9.99999974E-6 : f32
    %20 = vector.broadcast %cst_10 : f32 to vector<256x1xf32>
    %21 = arith.addf %17, %20 : vector<256x1xf32>
    %22 = math.rsqrt %21 : vector<256x1xf32>
    %23 = vector.broadcast %22 : vector<256x1xf32> to vector<256x32xf32>
    %24 = arith.mulf %19, %23 : vector<256x32xf32>
    %c0_11 = arith.constant 0 : index
    %c0_12 = arith.constant 0 : index
    %25 = vector.load %arg4[%c0_11, %c0_12] : memref<1x32xf32, #tpu.memory_space<vmem>>, vector<1x32xf32>
    %26 = vector.broadcast %25 : vector<1x32xf32> to vector<256x32xf32>
    %27 = arith.mulf %24, %26 : vector<256x32xf32>
    %c0_13 = arith.constant 0 : index
    %c0_14 = arith.constant 0 : index
    %28 = vector.load %arg5[%c0_13, %c0_14] : memref<1x32xf32, #tpu.memory_space<vmem>>, vector<1x32xf32>
    %29 = vector.broadcast %28 : vector<1x32xf32> to vector<256x32xf32>
    %30 = arith.addf %27, %29 : vector<256x32xf32>
    %cst_15 = arith.constant 0.000000e+00 : f32
    %31 = vector.broadcast %cst_15 : f32 to vector<256x32xf32>
    %32 = arith.maximumf %30, %31 : vector<256x32xf32>
    %33 = vector.shape_cast %32 : vector<256x32xf32> to vector<32x8x32xf32>
    %cst_16 = arith.constant dense<0xFF800000> : vector<32x32xf32>
    %34 = vector.multi_reduction <maximumf>, %33, %cst_16 [1] : vector<32x8x32xf32> to vector<32x32xf32>
    %c0_17 = arith.constant 0 : index
    %c0_18 = arith.constant 0 : index
    %35 = vector.load %arg7[%c0_17, %c0_18] : memref<32x32xf32, #tpu.memory_space<vmem>>, vector<32x32xf32>
    tpu.vector_store %arg7[%c0_17, %c0_18], %34 {strides = array<i32>} : memref<32x32xf32, #tpu.memory_space<vmem>>, vector<32x32xf32>,
    %c0_19 = arith.constant 0 : index
    %c0_20 = arith.constant 0 : index
    %c0_21 = arith.constant 0 : index
    %36 = vector.load %arg6[%c0_19, %c0_20, %c0_21] : memref<32x8x64xf32, #tpu.memory_space<vmem>>, vector<32x8x32xf32>
    tpu.vector_store %arg6[%c0_19, %c0_20, %c0_21], %0 {strides = array<i32>} : memref<32x8x64xf32, #tpu.memory_space<vmem>>, vector<32x8x32xf32>,
    %37 = vector.shape_cast %34 : vector<32x32xf32> to vector<32x1x32xf32>
    %38 = vector.shape_cast %37 : vector<32x1x32xf32> to vector<32x1x32xf32>
    %39 = vector.broadcast %38 : vector<32x1x32xf32> to vector<32x8x32xf32>
    %c0_22 = arith.constant 0 : index
    %c0_23 = arith.constant 0 : index
    %c32 = arith.constant 32 : index
    %40 = vector.load %arg6[%c0_22, %c0_23, %c32] : memref<32x8x64xf32, #tpu.memory_space<vmem>>, vector<32x8x32xf32>
    tpu.vector_store %arg6[%c0_22, %c0_23, %c32], %39 {strides = array<i32>} : memref<32x8x64xf32, #tpu.memory_space<vmem>>, vector<32x8x32xf32>,
    return
  }
  func.func @transform_0(%arg0: i32) -> (i32, i32, i32) {
    %c0_i32 = arith.constant 0 : i32
    %c0_i32_0 = arith.constant 0 : i32
    %c0_i32_1 = arith.constant 0 : i32
    return %arg0, %c0_i32, %c0_i32_0 : i32, i32, i32
  }
  func.func @transform_1(%arg0: i32) -> (i32, i32) {
    %c0_i32 = arith.constant 0 : i32
    %c0_i32_0 = arith.constant 0 : i32
    %c0_i32_1 = arith.constant 0 : i32
    return %c0_i32, %c0_i32_0 : i32, i32
  }
  func.func @transform_2(%arg0: i32) -> (i32, i32) {
    %c0_i32 = arith.constant 0 : i32
    %c0_i32_0 = arith.constant 0 : i32
    %c0_i32_1 = arith.constant 0 : i32
    return %c0_i32, %c0_i32_0 : i32, i32
  }
  func.func @transform_3(%arg0: i32) -> (i32, i32) {
    %c0_i32 = arith.constant 0 : i32
    %c0_i32_0 = arith.constant 0 : i32
    %c0_i32_1 = arith.constant 0 : i32
    return %c0_i32, %c0_i32_0 : i32, i32
  }
  func.func @transform_4(%arg0: i32) -> (i32, i32) {
    %c0_i32 = arith.constant 0 : i32
    %c0_i32_0 = arith.constant 0 : i32
    %c0_i32_1 = arith.constant 0 : i32
    return %c0_i32, %c0_i32_0 : i32, i32
  }
  func.func @transform_5(%arg0: i32) -> (i32, i32, i32) {
    %c0_i32 = arith.constant 0 : i32
    %c0_i32_0 = arith.constant 0 : i32
    %c0_i32_1 = arith.constant 0 : i32
    return %arg0, %c0_i32, %c0_i32_0 : i32, i32, i32
  }
  func.func @transform_6(%arg0: i32) -> (i32, i32) {
    %c0_i32 = arith.constant 0 : i32
    %c0_i32_0 = arith.constant 0 : i32
    return %arg0, %c0_i32 : i32, i32
  }
}

</mosaic_0001>

<bundles_post_ra>
// kernel: tpu_custom_call.1
= control target key start
LH: loop header
LB: loop body
LE: loop exit
PB: predicated region body
PF: predicated region fallthrough
CT: control target
= control target key end

     0   :  { %12 = vsyncpa [#allocation3], 0  ;;  %s3959_s0 = inlined_call_operand.vmem [shape: f32[64,8,32], index: 0, kind: input, shape index: {}]   ;;  %s3960_s1 = inlined_call_operand.vmem [shape: f32[32,32], index: 1, kind: input, shape index: {}]   ;;  %s3961_s2 = inlined_call_operand.vmem [shape: f32[1,32], index: 2, kind: input, shape index: {}]   ;;  %s3962_s3 = inlined_call_operand.vmem [shape: f32[1,32], index: 3, kind: input, shape index: {}]   ;;  %s3963_s4 = inlined_call_operand.vmem [shape: f32[1,32], index: 4, kind: input, shape index: {}]   ;;  %s3964_s5 = inlined_call_operand.hbm [shape: f32[64,8,64], index: 5, kind: output, shape index: {0}]   ;;  %s3965_s6 = inlined_call_operand.vmem [shape: f32[64,32], index: 6, kind: output, shape index: {1}]  }
   0x1   :  { %14 = vsyncpa [#allocation3 + $0x1], 0  ;;  %s2180_s21 = smov 0   ;;  %s2182_s22 = smov 0  }
   0x2   :  { %s2184_s23 = smov 0   ;;  %s2186_s24 = smov 0  }
   0x3 LB: > { %s2201_s25 = sadd.s32 4294967295, %s2139_s24   ;;  %s1904_s26 = sadd.s32 4294967294, %s2139_s24   ;;  %s2139_s24 = sphi %s2186_s24, %s4047_s24   ;;  %s2135_s23 = sphi %s2184_s23, %s4046_s23   ;;  %s2131_s22 = sphi %s2182_s22, %s4045_s22   ;;  %s2127_s21 = sphi %s2180_s21, %s4044_s21  }
   0x4   : > { %s2205_s27 = sadd.s32 1, %s2139_s24   ;;  %s137_s28 = sadd.s32 1, %s2135_s23 }
   0x5   : > { %s134_s29 = ssub.s32 %s2139_s24, %s2205_s27  ;;  %p147_p0 = scmp.ne.s32.totalorder %s2135_s23, %s2131_s22 }
   0x6   : > { %p135_p1 = scmp.eq.s32.totalorder %s134_s29, 0  ;;  %p148_p2 = scmp.eq.s32.totalorder %s2201_s25, 1 }
   0x7   : > { %p153_p3 = scmp.ne.s32.totalorder %s2131_s22, %s2127_s21  ;;  %p154_p4 = scmp.eq.s32.totalorder %s1904_s26, 1 }
   0x8   : > { %s2216_s30 = scalar_select %p135_p1, %s2135_s23, %s137_s28  }
   0x9   : > { %p2218_p5 = por %p148_p2, %p147_p0  ;;  %p2222_p6 = por %p154_p4, %p153_p3 }
   0xa   : > { %p1907_p7 = scmp.ge.s32.totalorder %s2139_s24, 1  ;;  %p219_p8 = scmp.lt.s32.totalorder %s2139_s24, 3 }
   0xc   : > { %p220_p9 = pnand %p1907_p7, %p219_p8 }
   0xe   : > { %223 = sbr.rel (%p220_p9) target bundleno = 725 (0x2d5), region = 40 }
  0x13   : > { %v302_v0 = vld [vmem:[%s3960_s1 + $0x18] sm:$0xff]  ;;  %v301_v1 = vld [vmem:[%s3960_s1 + $0x10] sm:$0xff]  ;;  %s1909_s13 = sshll.u32 %s2201_s25, 5  ;;  %s244_s14 = sand.u32 1, %s2131_s22   ;;  %v300_v2 = vld [vmem:[%s3960_s1 + $0x8] sm:$0xff]  ;;  %vm307_vm0 = vcmask 261120  }
  0x14   : > { %416 = vmatpush.msra.mxu0 %v302_v0  ;;  %1951 = vmatpush.msra.mxu1 %v302_v0  ;;  %p255_p10 = scmp.lt.s32.totalorder %s1909_s13, 63  ;;  %v299_v3 = vld [vmem:[%s3960_s1] sm:$0xff]  ;;  %s1908_s19 = sshll.u32 %s244_s14, 8 }
  0x15   : > { %1952 = vmatpush.msra.mxu2 %v302_v0  ;;  %1953 = vmatpush.msra.mxu3 %v302_v0  ;;  %s2252_s9 = scalar_lea.vmem [#allocation2], %s1908_s19  ;;  %v2382_v36 = vld [vmem:[%s3961_s2] ss:$0 sm:$0xff]  ;;  %s2142_s17 = smov 32  }
  0x16   : > { %417 = vmatpush.msra.mxu0 %v301_v1  ;;  %1954 = vmatpush.msra.mxu1 %v301_v1  ;;  %s4049_s13 = smov (!%p255_p10, %s1909_s13), 63  ;;  %s1911_s28 = sshll.u32 %s2201_s25, 2 }
  0x17   : > { %1955 = vmatpush.msra.mxu2 %v301_v1  ;;  %1956 = vmatpush.msra.mxu3 %v301_v1  ;;  %s1910_s20 = sshll.u32 %s4049_s13, 3  ;;  %p3788_p11 = scmp.lt.s32.totalorder %s1911_s28, 7 }
  0x18   : > { %418 = vmatpush.msra.mxu0 %v300_v2  ;;  %1957 = vmatpush.msra.mxu1 %v300_v2  ;;  %s2247_s29 = scalar_lea.vmem %s3959_s0, %s1910_s20  ;;  %s1950_s15 = sshll.u32 %s2201_s25, 8 }
  0x19   : > { %1958 = vmatpush.msra.mxu2 %v300_v2  ;;  %1959 = vmatpush.msra.mxu3 %v300_v2  ;;  %v267_v4 = vld [vmem:[%s2247_s29] sm:$0xff]  ;;  %v284_v8 = vld [vmem:[%s2247_s29 + $0x88] sm:$0xff]  ;;  %v293_v12 = vld [vmem:[%s2247_s29 + $0xd0] sm:$0xff]  ;;  %s4051_s28 = smov (!%p3788_p11, %s1911_s28), 7  ;;  %s1809_s18 = scalar_lea.hbm %s3964_s5, %s1950_s15 }
  0x1a   : > { %419 = vmatpush.msra.mxu0 %v299_v3  ;;  %1960 = vmatpush.msra.mxu1 %v299_v3  ;;  %v275_v5 = vld [vmem:[%s2247_s29 + $0x40] sm:$0xff]  ;;  %1631 = vst.msk [vmem:[%s2252_s9] sm:$0xff] %vm307_vm0, %v267_v4  ;;  %v292_v9 = vld [vmem:[%s2247_s29 + $0xc8] sm:$0xff]  ;;  %v269_v13 = vld [vmem:[%s2247_s29 + $0x10] sm:$0xff]  ;;  %s1912_s10 = sshll.u32 %s4051_s28, 3  ;;  %s1810_s19 = sshll.u32 %s2252_s9, 4  ;;  %s1811_s19 = int_to_ptr.vmem [resolvable:$true] %s1810_s19 }
  0x1b   : > { %v283_v6 = vld [vmem:[%s2247_s29 + $0x80] sm:$0xff]  ;;  %1961 = vmatpush.msra.mxu2 %v299_v3  ;;  %1962 = vmatpush.msra.mxu3 %v299_v3  ;;  %1639 = vst.msk [vmem:[%s2252_s9 + $0x40] sm:$0xff] %vm307_vm0, %v275_v5  ;;  %v268_v10 = vld [vmem:[%s2247_s29 + $0x8] sm:$0xff]  ;;  %v277_v14 = vld [vmem:[%s2247_s29 + $0x50] sm:$0xff]  ;;  %s3832_s13 = scalar_lea.vmem %s3965_s6, %s1912_s10  ;;  %s1812_s20 = sshll.u32 %s1809_s18, 4  ;;  %s1813_s20 = int_to_ptr.hbm [resolvable:$true] %s1812_s20 }
  0x1c   : > { %v291_v7 = vld [vmem:[%s2247_s29 + $0xc0] sm:$0xff]  ;;  %1913 = vmatmul.msk.f32.vlgmr.msra.gmra.mxu0 %vm307_vm0, %v267_v4  ;;  %1921 = vmatmul.msk.f32.vlgmr.msra.gmra.mxu1 %vm307_vm0, %v275_v5  ;;  %1647 = vst.msk [vmem:[%s2252_s9 + $0x80] sm:$0xff] %vm307_vm0, %v283_v6  ;;  %v276_v11 = vld [vmem:[%s2247_s29 + $0x48] sm:$0xff]  ;;  %v285_v15 = vld [vmem:[%s2247_s29 + $0x90] sm:$0xff]  ;;  %s1793_s26 = scalar_lea.sflag [#allocation3], %s244_s14  ;;  %s2091_s28 = sshra.s32 %s1813_s20, 4  ;;  %s2092_s28 = int_to_ptr.hbm [resolvable:$true] %s2091_s28 }
  0x1d   : > { %1929 = vmatmul.msk.f32.vlgmr.msra.gmra.mxu2 %vm307_vm0, %v283_v6  ;;  %1937 = vmatmul.msk.f32.vlgmr.msra.gmra.mxu3 %vm307_vm0, %v291_v7  ;;  %1655 = vst.msk [vmem:[%s2252_s9 + $0xc0] sm:$0xff] %vm307_vm0, %v291_v7  ;;  %v270_v16 = vld [vmem:[%s2247_s29 + $0x18] sm:$0xff]  ;;  %v271_v20 = vld [vmem:[%s2247_s29 + $0x20] sm:$0xff]  ;;  %v288_v24 = vld [vmem:[%s2247_s29 + $0xa8] sm:$0xff]  ;;  %s2097_s11 = scalar_lea.hbm %s3964_s5, 512  ;;  %p2098_p1 = scmp.lt.s32.totalorder %s2092_s28, %s3964_s5 }
  0x1e   : > { %1648 = vst.msk [vmem:[%s2252_s9 + $0x88] sm:$0xff] %vm307_vm0, %v284_v8  ;;  %v278_v17 = vld [vmem:[%s2247_s29 + $0x58] sm:$0xff]  ;;  %v287_v21 = vld [vmem:[%s2247_s29 + $0xa0] sm:$0xff]  ;;  %v272_v25 = vld [vmem:[%s2247_s29 + $0x28] sm:$0xff] }
  0x1f   : > { %1656 = vst.msk [vmem:[%s2252_s9 + $0xc8] sm:$0xff] %vm307_vm0, %v292_v9  ;;  %v286_v18 = vld [vmem:[%s2247_s29 + $0x98] sm:$0xff]  ;;  %v279_v22 = vld [vmem:[%s2247_s29 + $0x60] sm:$0xff]  ;;  %v296_v26 = vld [vmem:[%s2247_s29 + $0xe8] sm:$0xff] }
  0x20   : > { %1632 = vst.msk [vmem:[%s2252_s9 + $0x8] sm:$0xff] %vm307_vm0, %v268_v10  ;;  %v294_v19 = vld [vmem:[%s2247_s29 + $0xd8] sm:$0xff]  ;;  %v295_v23 = vld [vmem:[%s2247_s29 + $0xe0] sm:$0xff]  ;;  %v280_v27 = vld [vmem:[%s2247_s29 + $0x68] sm:$0xff] }
  0x21   : > { %1640 = vst.msk [vmem:[%s2252_s9 + $0x48] sm:$0xff] %vm307_vm0, %v276_v11  ;;  %v273_v28 = vld [vmem:[%s2247_s29 + $0x30] sm:$0xff]  ;;  %v290_v32 = vld [vmem:[%s2247_s29 + $0xb8] sm:$0xff] }
  0x22   : > { %1657 = vst.msk [vmem:[%s2252_s9 + $0xd0] sm:$0xff] %vm307_vm0, %v293_v12  ;;  %v289_v29 = vld [vmem:[%s2247_s29 + $0xb0] sm:$0xff]  ;;  %v274_v33 = vld [vmem:[%s2247_s29 + $0x38] sm:$0xff] }
  0x23   : > { %1633 = vst.msk [vmem:[%s2252_s9 + $0x10] sm:$0xff] %vm307_vm0, %v269_v13  ;;  %v297_v30 = vld [vmem:[%s2247_s29 + $0xf0] sm:$0xff]  ;;  %v282_v34 = vld [vmem:[%s2247_s29 + $0x78] sm:$0xff] }
  0x24   : > { %1914 = vmatmul.msk.f32.gmra.mxu0 %vm307_vm0, %v268_v10  ;;  %1922 = vmatmul.msk.f32.gmra.mxu1 %vm307_vm0, %v276_v11  ;;  %1641 = vst.msk [vmem:[%s2252_s9 + $0x50] sm:$0xff] %vm307_vm0, %v277_v14  ;;  %v281_v31 = vld [vmem:[%s2247_s29 + $0x70] sm:$0xff]  ;;  %v298_v35 = vld [vmem:[%s2247_s29 + $0xf8] sm:$0xff]  ;;  %s2093_s29 = scalar_lea.hbm %s2092_s28, 256 }
  0x25   : > { %1930 = vmatmul.msk.f32.gmra.mxu2 %vm307_vm0, %v284_v8  ;;  %1938 = vmatmul.msk.f32.gmra.mxu3 %vm307_vm0, %v292_v9  ;;  %1649 = vst.msk [vmem:[%s2252_s9 + $0x90] sm:$0xff] %vm307_vm0, %v285_v15  ;;  %p2094_p12 = scmp.ne.s32.totalorder %s2092_s28, %s2093_s29  ;;  %p2099_p2 = scmp.lt.s32.totalorder %s2097_s11, %s2093_s29 }
  0x26   : > { %1634 = vst.msk [vmem:[%s2252_s9 + $0x18] sm:$0xff] %vm307_vm0, %v270_v16 }
  0x27   : > { %1642 = vst.msk [vmem:[%s2252_s9 + $0x58] sm:$0xff] %vm307_vm0, %v278_v17  ;;  %p2095_p13 = pnand %p2094_p12, %p2218_p5  ;;  %p2100_p3 = por %p2099_p2, %p2098_p1 }
  0x28   : > { %1650 = vst.msk [vmem:[%s2252_s9 + $0x98] sm:$0xff] %vm307_vm0, %v286_v18 }
  0x29   : > { %1658 = vst.msk [vmem:[%s2252_s9 + $0xd8] sm:$0xff] %vm307_vm0, %v294_v19  ;;  %p2096_p0 = pneg %p2095_p13 }
  0x2a   : > { %1635 = vst.msk [vmem:[%s2252_s9 + $0x20] sm:$0xff] %vm307_vm0, %v271_v20 }
  0x2b   : > { %1651 = vst.msk [vmem:[%s2252_s9 + $0xa0] sm:$0xff] %vm307_vm0, %v287_v21  ;;  %p2101_p4 = pnand %p2100_p3, %p2096_p0 }
  0x2c   : > { %1915 = vmatmul.msk.f32.gmra.mxu0 %vm307_vm0, %v269_v13  ;;  %1923 = vmatmul.msk.f32.gmra.mxu1 %vm307_vm0, %v277_v14  ;;  %1643 = vst.msk [vmem:[%s2252_s9 + $0x60] sm:$0xff] %vm307_vm0, %v279_v22 }
  0x2d   : > { %1939 = vmatmul.msk.f32.gmra.mxu3 %vm307_vm0, %v293_v12  ;;  %1931 = vmatmul.msk.f32.gmra.mxu2 %vm307_vm0, %v285_v15  ;;  %1659 = vst.msk [vmem:[%s2252_s9 + $0xe0] sm:$0xff] %vm307_vm0, %v295_v23 }
  0x2e   : > { %1652 = vst.msk [vmem:[%s2252_s9 + $0xa8] sm:$0xff] %vm307_vm0, %v288_v24 }
  0x2f   : > { %1636 = vst.msk [vmem:[%s2252_s9 + $0x28] sm:$0xff] %vm307_vm0, %v272_v25 }
  0x30   : > { %1660 = vst.msk [vmem:[%s2252_s9 + $0xe8] sm:$0xff] %vm307_vm0, %v296_v26 }
  0x31   : > { %1644 = vst.msk [vmem:[%s2252_s9 + $0x68] sm:$0xff] %vm307_vm0, %v280_v27 }
  0x32   : > { %1637 = vst.msk [vmem:[%s2252_s9 + $0x30] sm:$0xff] %vm307_vm0, %v273_v28 }
  0x33   : > { %1653 = vst.msk [vmem:[%s2252_s9 + $0xb0] sm:$0xff] %vm307_vm0, %v289_v29 }
  0x34   : > { %1916 = vmatmul.msk.f32.gmra.mxu0 %vm307_vm0, %v270_v16  ;;  %1924 = vmatmul.msk.f32.gmra.mxu1 %vm307_vm0, %v278_v17  ;;  %1661 = vst.msk [vmem:[%s2252_s9 + $0xf0] sm:$0xff] %vm307_vm0, %v297_v30 }
  0x35   : > { %1932 = vmatmul.msk.f32.gmra.mxu2 %vm307_vm0, %v286_v18  ;;  %1940 = vmatmul.msk.f32.gmra.mxu3 %vm307_vm0, %v294_v19  ;;  %1645 = vst.msk [vmem:[%s2252_s9 + $0x70] sm:$0xff] %vm307_vm0, %v281_v31 }
  0x36   : > { %1654 = vst.msk [vmem:[%s2252_s9 + $0xb8] sm:$0xff] %vm307_vm0, %v290_v32 }
  0x37   : > { %1638 = vst.msk [vmem:[%s2252_s9 + $0x38] sm:$0xff] %vm307_vm0, %v274_v33 }
  0x38   : > { %1646 = vst.msk [vmem:[%s2252_s9 + $0x78] sm:$0xff] %vm307_vm0, %v282_v34 }
  0x39   : > { %1662 = vst.msk [vmem:[%s2252_s9 + $0xf8] sm:$0xff] %vm307_vm0, %v298_v35 }
  0x3c   : > { %1917 = vmatmul.msk.f32.gmra.mxu0 %vm307_vm0, %v271_v20  ;;  %1925 = vmatmul.msk.f32.gmra.mxu1 %vm307_vm0, %v279_v22 }
  0x3d   : > { %1933 = vmatmul.msk.f32.gmra.mxu2 %vm307_vm0, %v287_v21  ;;  %1941 = vmatmul.msk.f32.gmra.mxu3 %vm307_vm0, %v295_v23 }
  0x44   : > { %1918 = vmatmul.msk.f32.gmra.mxu0 %vm307_vm0, %v272_v25  ;;  %1926 = vmatmul.msk.f32.gmra.mxu1 %vm307_vm0, %v280_v27 }
  0x45   : > { %1934 = vmatmul.msk.f32.gmra.mxu2 %vm307_vm0, %v288_v24  ;;  %1942 = vmatmul.msk.f32.gmra.mxu3 %vm307_vm0, %v296_v26 }
  0x4c   : > { %1919 = vmatmul.msk.f32.gmra.mxu0 %vm307_vm0, %v273_v28  ;;  %1927 = vmatmul.msk.f32.gmra.mxu1 %vm307_vm0, %v281_v31 }
  0x4d   : > { %1935 = vmatmul.msk.f32.gmra.mxu2 %vm307_vm0, %v289_v29  ;;  %1943 = vmatmul.msk.f32.gmra.mxu3 %vm307_vm0, %v297_v30 }
  0x54   : > { %1920 = vmatmul.msk.f32.gmra.mxu0 %vm307_vm0, %v274_v33  ;;  %1928 = vmatmul.msk.f32.gmra.mxu1 %vm307_vm0, %v282_v34 }
  0x55   : > { %1936 = vmatmul.msk.f32.gmra.mxu2 %vm307_vm0, %v290_v32  ;;  %1944 = vmatmul.msk.f32.gmra.mxu3 %vm307_vm0, %v298_v35 }
  0x99   : > { %v421_v37 = vpop.f32.mrf.mxu0  ;;  %v445_v38 = vpop.f32.mrf.mxu1 }
  0x9a   : > { %v2385_v39 = vadd.f32 %v2382_v36, %v421_v37  ;;  %v2388_v40 = vadd.f32 %v2382_v36, %v445_v38 }
  0x9c   : > { %v541_v41 = vsel %vm307_vm0, %v2388_v40, 0.0  ;;  %v517_v42 = vsel %vm307_vm0, %v2385_v39, 0.0 }
  0x9d   : > { %542 = vadd.xlane.f32.xlu2 %v541_v41  ;;  %518 = vadd.xlane.f32.xlu0 %v517_v42 }
  0xa0   : > { %v469_v43 = vpop.f32.mrf.mxu2  ;;  %v493_v44 = vpop.f32.mrf.mxu3 }
  0xa1   : > { %v2395_v45 = vadd.f32 %v2382_v36, %v469_v43  ;;  %v2398_v46 = vadd.f32 %v2382_v36, %v493_v44  ;;  %v424_v47 = vpop.f32.mrf.mxu0  ;;  %v448_v48 = vpop.f32.mrf.mxu1 }
  0xa2   : > { %v2405_v51 = vadd.f32 %v2382_v36, %v424_v47  ;;  %v2423_v62 = vadd.f32 %v2382_v36, %v448_v48 }
  0xa3   : > { %v565_v49 = vsel %vm307_vm0, %v2395_v45, 0.0  ;;  %v589_v50 = vsel %vm307_vm0, %v2398_v46, 0.0 }
  0xa4   : > { %566 = vadd.xlane.f32.xlu1 %v565_v49  ;;  %v520_v60 = vsel %vm307_vm0, %v2405_v51, 0.0  ;;  %v544_v6 = vsel %vm307_vm0, %v2423_v62, 0.0 }
  0xa5   : > { %590 = vadd.xlane.f32.xlu0 %v589_v50 }
  0xa8   : > { %v472_v52 = vpop.f32.mrf.mxu2  ;;  %v496_v53 = vpop.f32.mrf.mxu3 }
  0xa9   : > { %v2408_v54 = vadd.f32 %v2382_v36, %v472_v52  ;;  %v2411_v55 = vadd.f32 %v2382_v36, %v496_v53  ;;  %v427_v56 = vpop.f32.mrf.mxu0  ;;  %v451_v57 = vpop.f32.mrf.mxu1 }
  0xaa   : > { %v2420_v61 = vadd.f32 %v2382_v36, %v427_v56  ;;  %v2435_v7 = vadd.f32 %v2382_v36, %v451_v57 }
  0xab   : > { %v592_v58 = vsel %vm307_vm0, %v2411_v55, 0.0  ;;  %v568_v59 = vsel %vm307_vm0, %v2408_v54, 0.0 }
  0xac   : > { %593 = vadd.xlane.f32.xlu1 %v592_v58  ;;  %569 = vadd.xlane.f32.xlu2 %v568_v59  ;;  %v523_v2 = vsel %vm307_vm0, %v2420_v61, 0.0  ;;  %v547_v12 = vsel %vm307_vm0, %v2435_v7, 0.0 }
  0xad   : > { %521 = vadd.xlane.f32.xlu0 %v520_v60 }
  0xb0   : > { %v499_v63 = vpop.f32.mrf.mxu3  ;;  %v475_v0 = vpop.f32.mrf.mxu2 }
  0xb1   : > { %v2426_v1 = vadd.f32 %v2382_v36, %v499_v63  ;;  %v430_v3 = vpop.f32.mrf.mxu0  ;;  %v454_v4 = vpop.f32.mrf.mxu1  ;;  %v2441_v9 = vadd.f32 %v2382_v36, %v475_v0 }
  0xb2   : > { %v2438_v8 = vadd.f32 %v2382_v36, %v454_v4  ;;  %v2450_v16 = vadd.f32 %v2382_v36, %v430_v3 }
  0xb3   : > { %v595_v5 = vsel %vm307_vm0, %v2426_v1, 0.0  ;;  %v571_v13 = vsel %vm307_vm0, %v2441_v9, 0.0 }
  0xb4   : > { %596 = vadd.xlane.f32.xlu2 %v595_v5  ;;  %524 = vadd.xlane.f32.xlu1 %v523_v2  ;;  %v550_v11 = vsel %vm307_vm0, %v2438_v8, 0.0  ;;  %v526_v20 = vsel %vm307_vm0, %v2450_v16, 0.0 }
  0xb5   : > { %545 = vadd.xlane.f32.xlu0 %v544_v6 }
  0xb8   : > { %v478_v10 = vpop.f32.mrf.mxu2  ;;  %v502_v15 = vpop.f32.mrf.mxu3 }
  0xb9   : > { %v433_v14 = vpop.f32.mrf.mxu0  ;;  %v2456_v18 = vadd.f32 %v2382_v36, %v502_v15  ;;  %v457_v23 = vpop.f32.mrf.mxu1  ;;  %v2465_v24 = vadd.f32 %v2382_v36, %v478_v10 }
  0xba   : > { %v2453_v17 = vadd.f32 %v2382_v36, %v433_v14  ;;  %v2471_v26 = vadd.f32 %v2382_v36, %v457_v23 }
  0xbb   : > { %v598_v21 = vsel %vm307_vm0, %v2456_v18, 0.0  ;;  %v574_v29 = vsel %vm307_vm0, %v2465_v24, 0.0 }
  0xbc   : > { %551 = vadd.xlane.f32.xlu2 %v550_v11  ;;  %548 = vadd.xlane.f32.xlu1 %v547_v12  ;;  %v529_v19 = vsel %vm307_vm0, %v2453_v17, 0.0  ;;  %v553_v30 = vsel %vm307_vm0, %v2471_v26, 0.0 }
  0xbd   : > { %572 = vadd.xlane.f32.xlu0 %v571_v13 }
  0xc0   : > { %v481_v22 = vpop.f32.mrf.mxu2  ;;  %v505_v27 = vpop.f32.mrf.mxu3 }
  0xc1   : > { %v2468_v25 = vadd.f32 %v2382_v36, %v481_v22  ;;  %v436_v31 = vpop.f32.mrf.mxu0  ;;  %v2483_v34 = vadd.f32 %v2382_v36, %v505_v27  ;;  %v460_v37 = vpop.f32.mrf.mxu1  ;;  %v2141_v22 = vmov 32.0  }
  0xc2   : > { %v2480_v33 = vadd.f32 %v2382_v36, %v436_v31  ;;  %v2495_v47 = vadd.f32 %v2382_v36, %v460_v37  ;;  %2009 = vrcp.f32 %v2141_v22 }
  0xc3   : > { %v577_v28 = vsel %vm307_vm0, %v2468_v25, 0.0  ;;  %v601_v41 = vsel %vm307_vm0, %v2483_v34, 0.0 }
  0xc4   : > { %530 = vadd.xlane.f32.xlu2 %v529_v19  ;;  %527 = vadd.xlane.f32.xlu1 %v526_v20  ;;  %v532_v38 = vsel %vm307_vm0, %v2480_v33, 0.0  ;;  %v556_v53 = vsel %vm307_vm0, %v2495_v47, 0.0 }
  0xc5   : > { %599 = vadd.xlane.f32.xlu0 %v598_v21 }
  0xc8   : > { %v484_v32 = vpop.f32.mrf.mxu2  ;;  %v508_v43 = vpop.f32.mrf.mxu3 }
  0xc9   : > { %v2486_v35 = vadd.f32 %v2382_v36, %v484_v32  ;;  %v439_v44 = vpop.f32.mrf.mxu0  ;;  %v2498_v48 = vadd.f32 %v2382_v36, %v508_v43  ;;  %v463_v57 = vpop.f32.mrf.mxu1 }
  0xca   : > { %v2501_v49 = vadd.f32 %v2382_v36, %v439_v44  ;;  %v2510_v59 = vadd.f32 %v2382_v36, %v463_v57  ;;  %v2010_v23 = vpop.eup %2009 }
  0xcb   : > { %v580_v42 = vsel %vm307_vm0, %v2486_v35, 0.0  ;;  %v604_v52 = vsel %vm307_vm0, %v2498_v48, 0.0  ;;  %v614_v27 = vmul.f32 32.0, %v2010_v23  ;;  %vm618_vm1 = vweird.f32 %v2010_v23 }
  0xcc   : > { %578 = vadd.xlane.f32.xlu2 %v577_v28  ;;  %575 = vadd.xlane.f32.xlu1 %v574_v29  ;;  %v535_v56 = vsel %vm307_vm0, %v2501_v49, 0.0  ;;  %v559_v0 = vsel %vm307_vm0, %v2510_v59, 0.0 }
  0xcd   : > { %554 = vadd.xlane.f32.xlu0 %v553_v30  ;;  %v615_v28 = vsub.f32 1.0, %v614_v27 }
  0xcf   : > { %v616_v29 = vmul.f32 %v2010_v23, %v615_v28 }
  0xd0   : > { %v487_v50 = vpop.f32.mrf.mxu2  ;;  %v511_v58 = vpop.f32.mrf.mxu3 }
  0xd1   : > { %v2513_v60 = vadd.f32 %v2382_v36, %v487_v50  ;;  %v2516_v63 = vadd.f32 %v2382_v36, %v511_v58  ;;  %v442_v4 = vpop.f32.mrf.mxu0  ;;  %v466_v6 = vpop.f32.mrf.mxu1  ;;  %v617_v30 = vadd.f32 %v2010_v23, %v616_v29 }
  0xd2   : > { %v2525_v10 = vadd.f32 %v2382_v36, %v442_v4  ;;  %v2531_v12 = vadd.f32 %v2382_v36, %v466_v6 }
  0xd3   : > { %v583_v2 = vsel %vm307_vm0, %v2513_v60, 0.0  ;;  %v607_v3 = vsel %vm307_vm0, %v2516_v63, 0.0  ;;  %v2544_v31 = vsel %vm618_vm1, %v2010_v23, %v617_v30 }
  0xd4   : > { %533 = vadd.xlane.f32.xlu2 %v532_v38  ;;  %602 = vadd.xlane.f32.xlu1 %v601_v41  ;;  %v538_v14 = vsel %vm307_vm0, %v2525_v10, 0.0  ;;  %v562_v15 = vsel %vm307_vm0, %v2531_v12, 0.0 }
  0xd5   : > { %581 = vadd.xlane.f32.xlu0 %v580_v42 }
  0xd8   : > { %v490_v5 = vpop.f32.mrf.mxu2  ;;  %v514_v19 = vpop.f32.mrf.mxu3 }
  0xd9   : > { %v2528_v11 = vadd.f32 %v2382_v36, %v490_v5  ;;  %v2540_v20 = vadd.f32 %v2382_v36, %v514_v19 }
  0xdb   : > { %v586_v13 = vsel %vm307_vm0, %v2528_v11, 0.0  ;;  %v610_v21 = vsel %vm307_vm0, %v2540_v20, 0.0 }
  0xdc   : > { %605 = vadd.xlane.f32.xlu2 %v604_v52  ;;  %557 = vadd.xlane.f32.xlu1 %v556_v53 }
  0xdd   : > { %536 = vadd.xlane.f32.xlu0 %v535_v56 }
  0xe4   : > { %560 = vadd.xlane.f32.xlu2 %v559_v0  ;;  %584 = vadd.xlane.f32.xlu1 %v583_v2 }
  0xe5   : > { %608 = vadd.xlane.f32.xlu0 %v607_v3 }
  0xec   : > { %587 = vadd.xlane.f32.xlu2 %v586_v13  ;;  %539 = vadd.xlane.f32.xlu1 %v538_v14 }
  0xed   : > { %563 = vadd.xlane.f32.xlu0 %v562_v15 }
  0xf4   : > { %611 = vadd.xlane.f32.xlu1 %v610_v21 }
 0x110   : > { %v543_v32 = vpop.xlane.xlu2 %542  ;;  %v519_v37 = vpop.xlane.xlu0 %518 }
 0x111   : > { %v628_v38 = vmul.f32 %v2544_v31, %v543_v32  ;;  %v620_v36 = vmul.f32 %v2544_v31, %v519_v37 }
 0x113   : > { %v2549_v41 = vsub.f32 %v2388_v40, %v628_v38  ;;  %v2552_v42 = vsub.f32 %v2385_v39, %v620_v36 }
 0x115   : > { %v692_v43 = vmul.f32 %v2549_v41, %v2549_v41  ;;  %v684_v44 = vmul.f32 %v2552_v42, %v2552_v42 }
 0x117   : > { %v567_v50 = vpop.xlane.xlu1 %566  ;;  %v740_v52 = vsel %vm307_vm0, %v692_v43, 0.0  ;;  %v716_v53 = vsel %vm307_vm0, %v684_v44, 0.0 }
 0x118   : > { %v636_v56 = vmul.f32 %v2544_v31, %v567_v50  ;;  %741 = vadd.xlane.f32.xlu1 %v740_v52  ;;  %717 = vadd.xlane.f32.xlu2 %v716_v53  ;;  %v591_v40 = vpop.xlane.xlu0 %590 }
 0x119   : > { %v644_v57 = vmul.f32 %v2544_v31, %v591_v40 }
 0x11a   : > { %v2563_v39 = vsub.f32 %v2395_v45, %v636_v56 }
 0x11b   : > { %v2566_v58 = vsub.f32 %v2398_v46, %v644_v57 }
 0x11c   : > { %v700_v0 = vmul.f32 %v2563_v39, %v2563_v39 }
 0x11d   : > { %v708_v2 = vmul.f32 %v2566_v58, %v2566_v58 }
 0x11e   : > { %v764_v3 = vsel %vm307_vm0, %v700_v0, 0.0 }
 0x11f   : > { %v594_v4 = vpop.xlane.xlu1 %593  ;;  %v570_v5 = vpop.xlane.xlu2 %569  ;;  %765 = vadd.xlane.f32.xlu0 %v764_v3  ;;  %v788_v6 = vsel %vm307_vm0, %v708_v2, 0.0 }
 0x120   : > { %v637_v13 = vmul.f32 %v2544_v31, %v570_v5  ;;  %789 = vadd.xlane.f32.xlu2 %v788_v6  ;;  %v522_v45 = vpop.xlane.xlu0 %521  ;;  %v645_v15 = vmul.f32 %v2544_v31, %v594_v4 }
 0x121   : > { %v621_v46 = vmul.f32 %v2544_v31, %v522_v45 }
 0x122   : > { %v2577_v14 = vsub.f32 %v2408_v54, %v637_v13  ;;  %v2589_v27 = vsub.f32 %v2411_v55, %v645_v15 }
 0x123   : > { %v2581_v19 = vsub.f32 %v2405_v51, %v621_v46 }
 0x124   : > { %v701_v21 = vmul.f32 %v2577_v14, %v2577_v14  ;;  %v709_v55 = vmul.f32 %v2589_v27, %v2589_v27 }
 0x125   : > { %v685_v22 = vmul.f32 %v2581_v19, %v2581_v19 }
 0x126   : > { %v767_v23 = vsel %vm307_vm0, %v701_v21, 0.0 }
 0x127   : > { %v597_v28 = vpop.xlane.xlu2 %596  ;;  %768 = vadd.xlane.f32.xlu1 %v767_v23  ;;  %v525_v54 = vpop.xlane.xlu1 %524  ;;  %v719_v29 = vsel %vm307_vm0, %v685_v22, 0.0 }
 0x128   : > { %v622_v30 = vmul.f32 %v2544_v31, %v525_v54  ;;  %720 = vadd.xlane.f32.xlu0 %v719_v29  ;;  %v546_v51 = vpop.xlane.xlu0 %545  ;;  %v646_v37 = vmul.f32 %v2544_v31, %v597_v28 }
 0x129   : > { %v629_v32 = vmul.f32 %v2544_v31, %v546_v51 }
 0x12a   : > { %v2596_v38 = vsub.f32 %v2420_v61, %v622_v30  ;;  %v2608_v50 = vsub.f32 %v2426_v1, %v646_v37 }
 0x12b   : > { %v2599_v36 = vsub.f32 %v2423_v62, %v629_v32  ;;  %v791_v62 = vsel %vm307_vm0, %v709_v55, 0.0 }
 0x12c   : > { %v686_v43 = vmul.f32 %v2596_v38, %v2596_v38  ;;  %v710_v3 = vmul.f32 %v2608_v50, %v2608_v50 }
 0x12d   : > { %v693_v44 = vmul.f32 %v2599_v36, %v2599_v36 }
 0x12e   : > { %v722_v52 = vsel %vm307_vm0, %v686_v43, 0.0  ;;  %v794_v45 = vsel %vm307_vm0, %v710_v3, 0.0 }
 0x12f   : > { %v552_v53 = vpop.xlane.xlu2 %551  ;;  %723 = vadd.xlane.f32.xlu1 %v722_v52  ;;  %v549_v61 = vpop.xlane.xlu1 %548  ;;  %v743_v56 = vsel %vm307_vm0, %v693_v44, 0.0 }
 0x130   : > { %v630_v40 = vmul.f32 %v2544_v31, %v549_v61  ;;  %792 = vadd.xlane.f32.xlu0 %v791_v62  ;;  %744 = vadd.xlane.f32.xlu2 %v743_v56  ;;  %v573_v57 = vpop.xlane.xlu0 %572  ;;  %v631_v2 = vmul.f32 %v2544_v31, %v552_v53 }
 0x131   : > { %v638_v0 = vmul.f32 %v2544_v31, %v573_v57 }
 0x132   : > { %v2617_v1 = vsub.f32 %v2435_v7, %v630_v40  ;;  %v2629_v13 = vsub.f32 %v2438_v8, %v631_v2 }
 0x133   : > { %v2622_v4 = vsub.f32 %v2441_v9, %v638_v0 }
 0x134   : > { %v694_v5 = vmul.f32 %v2617_v1, %v2617_v1  ;;  %v695_v8 = vmul.f32 %v2629_v13, %v2629_v13 }
 0x135   : > { %v702_v6 = vmul.f32 %v2622_v4, %v2622_v4 }
 0x136   : > { %v746_v15 = vsel %vm307_vm0, %v694_v5, 0.0  ;;  %v749_v29 = vsel %vm307_vm0, %v695_v8, 0.0 }
 0x137   : > { %v531_v46 = vpop.xlane.xlu2 %530  ;;  %795 = vadd.xlane.f32.xlu1 %v794_v45  ;;  %v528_v7 = vpop.xlane.xlu1 %527  ;;  %v770_v21 = vsel %vm307_vm0, %v702_v6, 0.0 }
 0x138   : > { %v623_v9 = vmul.f32 %v2544_v31, %v528_v7  ;;  %747 = vadd.xlane.f32.xlu0 %v746_v15  ;;  %771 = vadd.xlane.f32.xlu2 %v770_v21  ;;  %v600_v22 = vpop.xlane.xlu0 %599  ;;  %v624_v44 = vmul.f32 %v2544_v31, %v531_v46 }
 0x139   : > { %v647_v28 = vmul.f32 %v2544_v31, %v600_v22 }
 0x13a   : > { %v2636_v23 = vsub.f32 %v2450_v16, %v623_v9  ;;  %v2665_v40 = vsub.f32 %v2453_v17, %v624_v44 }
 0x13b   : > { %v2645_v30 = vsub.f32 %v2456_v18, %v647_v28 }
 0x13c   : > { %v687_v54 = vmul.f32 %v2636_v23, %v2636_v23  ;;  %v688_v46 = vmul.f32 %v2665_v40, %v2665_v40 }
 0x13d   : > { %v711_v61 = vmul.f32 %v2645_v30, %v2645_v30 }
 0x13e   : > { %v725_v37 = vsel %vm307_vm0, %v687_v54, 0.0 }
 0x13f   : > { %v579_v51 = vpop.xlane.xlu2 %578  ;;  %750 = vadd.xlane.f32.xlu1 %v749_v29  ;;  %v576_v32 = vpop.xlane.xlu1 %575  ;;  %v797_v3 = vsel %vm307_vm0, %v711_v61, 0.0 }
 0x140   : > { %v640_v16 = vmul.f32 %v2544_v31, %v579_v51  ;;  %v639_v55 = vmul.f32 %v2544_v31, %v576_v32  ;;  %726 = vadd.xlane.f32.xlu2 %v725_v37  ;;  %v555_v43 = vpop.xlane.xlu0 %554 }
 0x141   : > { %v632_v18 = vmul.f32 %v2544_v31, %v555_v43 }
 0x142   : > { %v2652_v52 = vsub.f32 %v2468_v25, %v640_v16  ;;  %v2655_v53 = vsub.f32 %v2465_v24, %v639_v55 }
 0x143   : > { %v2670_v24 = vsub.f32 %v2471_v26, %v632_v18 }
 0x144   : > { %v704_v62 = vmul.f32 %v2652_v52, %v2652_v52  ;;  %v703_v56 = vmul.f32 %v2655_v53, %v2655_v53 }
 0x145   : > { %v696_v7 = vmul.f32 %v2670_v24, %v2670_v24 }
 0x146   : > { %v776_v25 = vsel %vm307_vm0, %v704_v62, 0.0  ;;  %v773_v57 = vsel %vm307_vm0, %v703_v56, 0.0 }
 0x147   : > { %v534_v0 = vpop.xlane.xlu2 %533  ;;  %777 = vadd.xlane.f32.xlu1 %v776_v25  ;;  %v603_v2 = vpop.xlane.xlu1 %602  ;;  %774 = vadd.xlane.f32.xlu0 %v773_v57  ;;  %v752_v54 = vsel %vm307_vm0, %v696_v7, 0.0 }
 0x148   : > { %v625_v5 = vmul.f32 %v2544_v31, %v534_v0  ;;  %798 = vadd.xlane.f32.xlu2 %v797_v3  ;;  %v582_v6 = vpop.xlane.xlu0 %581  ;;  %v648_v45 = vmul.f32 %v2544_v31, %v603_v2 }
 0x149   : > { %v641_v26 = vmul.f32 %v2544_v31, %v582_v6 }
 0x14a   : > { %v2675_v17 = vsub.f32 %v2480_v33, %v625_v5  ;;  %v2686_v21 = vsub.f32 %v2483_v34, %v648_v45  ;;  %v728_v33 = vsel %vm307_vm0, %v688_v46, 0.0 }
 0x14b   : > { %v2691_v22 = vsub.f32 %v2486_v35, %v641_v26 }
 0x14c   : > { %v689_v15 = vmul.f32 %v2675_v17, %v2675_v17  ;;  %v712_v37 = vmul.f32 %v2686_v21, %v2686_v21 }
 0x14d   : > { %v705_v16 = vmul.f32 %v2691_v22, %v2691_v22 }
 0x14e   : > { %v731_v9 = vsel %vm307_vm0, %v689_v15, 0.0 }
 0x14f   : > { %v606_v8 = vpop.xlane.xlu2 %605  ;;  %732 = vadd.xlane.f32.xlu1 %v731_v9  ;;  %v558_v28 = vpop.xlane.xlu1 %557  ;;  %729 = vadd.xlane.f32.xlu0 %v728_v33  ;;  %v779_v56 = vsel %vm307_vm0, %v705_v16, 0.0 }
 0x150   : > { %v649_v29 = vmul.f32 %v2544_v31, %v606_v8  ;;  %753 = vadd.xlane.f32.xlu2 %v752_v54  ;;  %v537_v51 = vpop.xlane.xlu0 %536  ;;  %v633_v32 = vmul.f32 %v2544_v31, %v558_v28 }
 0x151   : > { %v626_v35 = vmul.f32 %v2544_v31, %v537_v51 }
 0x152   : > { %v2696_v34 = vsub.f32 %v2498_v48, %v649_v29  ;;  %v2707_v43 = vsub.f32 %v2495_v47, %v633_v32  ;;  %v800_v48 = vsel %vm307_vm0, %v712_v37, 0.0 }
 0x153   : > { %v2712_v18 = vsub.f32 %v2501_v49, %v626_v35 }
 0x154   : > { %v713_v55 = vmul.f32 %v2696_v34, %v2696_v34  ;;  %v697_v2 = vmul.f32 %v2707_v43, %v2707_v43 }
 0x155   : > { %v690_v3 = vmul.f32 %v2712_v18, %v2712_v18 }
 0x156   : > { %v803_v44 = vsel %vm307_vm0, %v713_v55, 0.0 }
 0x157   : > { %v561_v61 = vpop.xlane.xlu2 %560  ;;  %804 = vadd.xlane.f32.xlu1 %v803_v44  ;;  %v585_v62 = vpop.xlane.xlu1 %584  ;;  %801 = vadd.xlane.f32.xlu0 %v800_v48  ;;  %v734_v15 = vsel %vm307_vm0, %v690_v3, 0.0 }
 0x158   : > { %v634_v25 = vmul.f32 %v2544_v31, %v561_v61  ;;  %780 = vadd.xlane.f32.xlu2 %v779_v56  ;;  %v609_v57 = vpop.xlane.xlu0 %608  ;;  %v642_v0 = vmul.f32 %v2544_v31, %v585_v62 }
 0x159   : > { %v650_v49 = vmul.f32 %v2544_v31, %v609_v57 }
 0x15a   : > { %v2717_v47 = vsub.f32 %v2510_v59, %v634_v25  ;;  %v2728_v6 = vsub.f32 %v2513_v60, %v642_v0  ;;  %v755_v59 = vsel %vm307_vm0, %v697_v2, 0.0 }
 0x15b   : > { %v2733_v46 = vsub.f32 %v2516_v63, %v650_v49 }
 0x15c   : > { %v698_v5 = vmul.f32 %v2717_v47, %v2717_v47  ;;  %3973 = vst [vmem:[#allocation5_spill] sm:$0xff] %v2728_v6  ;;  %v706_v28 = vmul.f32 %v2728_v6, %v2728_v6 }
 0x15d   : > { %3974 = vst [vmem:[#allocation6_spill] sm:$0xff] %v2733_v46  ;;  %v714_v54 = vmul.f32 %v2733_v46, %v2733_v46 }
 0x15e   : > { %v758_v45 = vsel %vm307_vm0, %v698_v5, 0.0 }
 0x15f   : > { %v588_v26 = vpop.xlane.xlu2 %587  ;;  %759 = vadd.xlane.f32.xlu1 %v758_v45  ;;  %v540_v7 = vpop.xlane.xlu1 %539  ;;  %756 = vadd.xlane.f32.xlu0 %v755_v59  ;;  %v806_v16 = vsel %vm307_vm0, %v714_v54, 0.0 }
 0x160   : > { %v643_v9 = vmul.f32 %v2544_v31, %v588_v26  ;;  %735 = vadd.xlane.f32.xlu2 %v734_v15  ;;  %v564_v33 = vpop.xlane.xlu0 %563  ;;  %v627_v8 = vmul.f32 %v2544_v31, %v540_v7 }
 0x161   : > { %v635_v63 = vmul.f32 %v2544_v31, %v564_v33 }
 0x162   : > { %v2738_v60 = vsub.f32 %v2528_v11, %v643_v9  ;;  %v2749_v51 = vsub.f32 %v2525_v10, %v627_v8  ;;  %v782_v11 = vsel %vm307_vm0, %v706_v28, 0.0 }
 0x163   : > { %v2754_v37 = vsub.f32 %v2531_v12, %v635_v63 }
 0x164   : > { %v707_v29 = vmul.f32 %v2738_v60, %v2738_v60  ;;  %3975 = vst [vmem:[#allocation7_spill] sm:$0xff] %v2749_v51  ;;  %v691_v44 = vmul.f32 %v2749_v51, %v2749_v51 }
 0x165   : > { %3976 = vst [vmem:[#allocation8_spill] sm:$0xff] %v2754_v37  ;;  %v699_v10 = vmul.f32 %v2754_v37, %v2754_v37 }
 0x166   : > { %v785_v32 = vsel %vm307_vm0, %v707_v29, 0.0  ;;  %v737_v12 = vsel %vm307_vm0, %v691_v44, 0.0 }
 0x167   : > { %786 = vadd.xlane.f32.xlu1 %v785_v32  ;;  %v612_v35 = vpop.xlane.xlu1 %611  ;;  %783 = vadd.xlane.f32.xlu0 %v782_v11  ;;  %v761_v61 = vsel %vm307_vm0, %v699_v10, 0.0 }
 0x168   : > { %807 = vadd.xlane.f32.xlu2 %v806_v16  ;;  %v651_v55 = vmul.f32 %v2544_v31, %v612_v35 }
 0x16a   : > { %v2763_v48 = vsub.f32 %v2540_v20, %v651_v55 }
 0x16c   : > { %3977 = vst [vmem:[#allocation9_spill] sm:$0xff] %v2763_v48  ;;  %v715_v62 = vmul.f32 %v2763_v48, %v2763_v48 }
 0x16e   : > { %v809_v56 = vsel %vm307_vm0, %v715_v62, 0.0 }
 0x16f   : > { %738 = vadd.xlane.f32.xlu0 %v737_v12 }
 0x170   : > { %762 = vadd.xlane.f32.xlu2 %v761_v61 }
 0x177   : > { %810 = vadd.xlane.f32.xlu0 %v809_v56 }
 0x18b   : > { %v742_v25 = vpop.xlane.xlu1 %741  ;;  %v718_v57 = vpop.xlane.xlu2 %717 }
 0x18c   : > { %v820_v0 = vmul.f32 %v742_v25, %v2544_v31  ;;  %v812_v2 = vmul.f32 %v718_v57, %v2544_v31 }
 0x18e   : > { %v2772_v20 = vadd.f32 1e-05, %v820_v0  ;;  %v844_v49 = vadd.f32 1e-05, %v812_v2 }
 0x190   : > { %2011 = vrsqrt.f32 %v2772_v20  ;;  %vm882_vm3 = vweird.f32 %v844_v49  ;;  %vm962_vm6 = vweird.f32 %v2772_v20 }
 0x191   : > { %2013 = vrsqrt.f32 %v844_v49 }
 0x192   : > { %v766_v3 = vpop.xlane.xlu0 %765 }
 0x193   : > { %v828_v5 = vmul.f32 %v766_v3, %v2544_v31  ;;  %v790_v45 = vpop.xlane.xlu2 %789 }
 0x194   : > { %v836_v59 = vmul.f32 %v790_v45, %v2544_v31 }
 0x195   : > { %v2777_v26 = vadd.f32 1e-05, %v828_v5 }
 0x196   : > { %v2779_v7 = vpop.eup %2011  ;;  %v2781_v15 = vadd.f32 1e-05, %v836_v59 }
 0x197   : > { %v2014_v9 = vpop.eup %2013  ;;  %v957_v33 = vmul.f32 %v2779_v7, %v2772_v20  ;;  %2015 = vrsqrt.f32 %v2777_v26  ;;  %vm963_vm5 = vweird.f32 %v2779_v7  ;;  %vm1042_vm8 = vweird.f32 %v2777_v26 }
 0x198   : > { %v877_v8 = vmul.f32 %v2014_v9, %v844_v49  ;;  %2017 = vrsqrt.f32 %v2781_v15  ;;  %vm883_vm2 = vweird.f32 %v2014_v9  ;;  %v2817_v49 = vld [vmem:[%s3962_s3] ss:$0 sm:$0xff]  ;;  %vm2833_vm7 = vmor %vm962_vm6, %vm963_vm5  ;;  %vm1122_vm11 = vweird.f32 %v2781_v15 }
 0x199   : > { %v958_v54 = vmul.f32 %v2779_v7, %v957_v33  ;;  %vm884_vm4 = vmor %vm882_vm3, %vm883_vm2 }
 0x19a   : > { %v878_v28 = vmul.f32 %v2014_v9, %v877_v8  ;;  %v769_v63 = vpop.xlane.xlu1 %768 }
 0x19b   : > { %v829_v29 = vmul.f32 %v769_v63, %v2544_v31  ;;  %v721_v32 = vpop.xlane.xlu0 %720  ;;  %v959_v61 = vmul.f32 0.5, %v958_v54 }
 0x19c   : > { %v879_v11 = vmul.f32 0.5, %v878_v28  ;;  %v813_v35 = vmul.f32 %v721_v32, %v2544_v31 }
 0x19d   : > { %v2790_v16 = vpop.eup %2015  ;;  %v2792_v55 = vadd.f32 1e-05, %v829_v29  ;;  %v960_v0 = vsub.f32 1.5, %v959_v61 }
 0x19e   : > { %v2794_v44 = vpop.eup %2017  ;;  %v880_v10 = vsub.f32 1.5, %v879_v11  ;;  %v2796_v12 = vadd.f32 1e-05, %v813_v35  ;;  %v1037_v62 = vmul.f32 %v2790_v16, %v2777_v26  ;;  %vm1043_vm9 = vweird.f32 %v2790_v16 }
 0x19f   : > { %2019 = vrsqrt.f32 %v2792_v55  ;;  %v1117_v25 = vmul.f32 %v2794_v44, %v2781_v15  ;;  %v961_v35 = vmul.f32 %v2779_v7, %v960_v0  ;;  %vm1123_vm10 = vweird.f32 %v2794_v44  ;;  %vm2884_vm13 = vmor %vm1042_vm8, %vm1043_vm9 }
 0x1a0   : > { %v881_v56 = vmul.f32 %v2014_v9, %v880_v10  ;;  %2021 = vrsqrt.f32 %v2796_v12  ;;  %v1038_v3 = vmul.f32 %v2790_v16, %v1037_v62  ;;  %vm1052_vm12 = vweird.f32 %v2792_v55  ;;  %vm2891_vm15 = vmor %vm1122_vm11, %vm1123_vm10 }
 0x1a1   : > { %v1118_v33 = vmul.f32 %v2794_v44, %v1117_v25  ;;  %v965_v20 = vsel %vm2833_vm7, %v2779_v7, %v961_v35  ;;  %vm892_vm14 = vweird.f32 %v2796_v12 }
 0x1a2   : > { %v724_v57 = vpop.xlane.xlu1 %723  ;;  %v885_v2 = vsel %vm884_vm4, %v2014_v9, %v881_v56  ;;  %v1039_v10 = vmul.f32 0.5, %v1038_v3 }
 0x1a3   : > { %v814_v5 = vmul.f32 %v724_v57, %v2544_v31  ;;  %v745_v45 = vpop.xlane.xlu2 %744  ;;  %v793_v59 = vpop.xlane.xlu0 %792  ;;  %v1196_v9 = vmul.f32 %v885_v2, %v2552_v42  ;;  %v1119_v61 = vmul.f32 0.5, %v1118_v33  ;;  %v2843_v2 = vld [vmem:[%s3963_s4] ss:$0 sm:$0xff] }
 0x1a4   : > { %v821_v8 = vmul.f32 %v745_v45, %v2544_v31  ;;  %v837_v11 = vmul.f32 %v793_v59, %v2544_v31  ;;  %v1040_v3 = vsub.f32 1.5, %v1039_v10  ;;  %v1204_v10 = vmul.f32 %v965_v20, %v2549_v41 }
 0x1a5   : > { %v2808_v28 = vpop.eup %2019  ;;  %v2810_v63 = vadd.f32 1e-05, %v814_v5  ;;  %v1232_v25 = vmul.f32 %v2817_v49, %v1196_v9  ;;  %v1120_v59 = vsub.f32 1.5, %v1119_v61 }
 0x1a6   : > { %v2812_v54 = vpop.eup %2021  ;;  %v1047_v29 = vmul.f32 %v2808_v28, %v2792_v55  ;;  %v2822_v32 = vadd.f32 1e-05, %v821_v8  ;;  %v2838_v57 = vadd.f32 1e-05, %v837_v11  ;;  %v1041_v56 = vmul.f32 %v2790_v16, %v1040_v3 }
 0x1a7   : > { %2023 = vrsqrt.f32 %v2810_v63  ;;  %v887_v62 = vmul.f32 %v2812_v54, %v2796_v12  ;;  %v1240_v37 = vmul.f32 %v2817_v49, %v1204_v10  ;;  %vm1053_vm1 = vweird.f32 %v2808_v28 }
 0x1a8   : > { %2025 = vrsqrt.f32 %v2822_v32  ;;  %v1048_v42 = vmul.f32 %v2808_v28, %v1047_v29  ;;  %vm893_vm2 = vweird.f32 %v2812_v54  ;;  %vm2927_vm3 = vmor %vm1052_vm12, %vm1053_vm1  ;;  %vm902_vm7 = vweird.f32 %v2810_v63 }
 0x1a9   : > { %v888_v33 = vmul.f32 %v2812_v54, %v887_v62  ;;  %2027 = vrsqrt.f32 %v2838_v57  ;;  %v1268_v62 = vadd.f32 %v2843_v2, %v1232_v25  ;;  %vm2949_vm6 = vmor %vm892_vm14, %vm893_vm2  ;;  %vm972_vm9 = vweird.f32 %v2822_v32 }
 0x1aa   : > { %v796_v0 = vpop.xlane.xlu1 %795  ;;  %v1049_v29 = vmul.f32 0.5, %v1048_v42  ;;  %vm1132_vm11 = vweird.f32 %v2838_v57 }
 0x1ab   : > { %v838_v5 = vmul.f32 %v796_v0, %v2544_v31  ;;  %v772_v45 = vpop.xlane.xlu2 %771  ;;  %v748_v8 = vpop.xlane.xlu0 %747 }
 0x1ac   : > { %v830_v7 = vmul.f32 %v772_v45, %v2544_v31  ;;  %v822_v0 = vmul.f32 %v748_v8, %v2544_v31  ;;  %v889_v45 = vmul.f32 0.5, %v888_v33  ;;  %v1050_v48 = vsub.f32 1.5, %v1049_v29 }
 0x1ad   : > { %v2852_v9 = vpop.eup %2023  ;;  %v2855_v11 = vadd.f32 1e-05, %v838_v5  ;;  %v1121_v5 = vmul.f32 %v2794_v44, %v1120_v59  ;;  %v1300_v8 = vmax.f32 %v1268_v62, 0.0 }
 0x1ae   : > { %v2858_v35 = vpop.eup %2025  ;;  %v897_v61 = vmul.f32 %v2852_v9, %v2810_v63  ;;  %v2872_v20 = vadd.f32 1e-05, %v830_v7  ;;  %v2898_v26 = vadd.f32 1e-05, %v822_v0  ;;  %v1051_v51 = vmul.f32 %v2808_v28, %v1050_v48 }
 0x1af   : > { %v967_v42 = vmul.f32 %v2858_v35, %v2822_v32  ;;  %2029 = vrsqrt.f32 %v2855_v11  ;;  %v2877_v3 = vpop.eup %2027  ;;  %v1125_v62 = vsel %vm2891_vm15, %v2794_v44, %v1121_v5  ;;  %v1276_v44 = vadd.f32 %v2843_v2, %v1240_v37 }
 0x1b0   : > { %v898_v41 = vmul.f32 %v2852_v9, %v897_v61  ;;  %v1127_v10 = vmul.f32 %v2877_v3, %v2838_v57  ;;  %2031 = vrsqrt.f32 %v2872_v20  ;;  %v1332_v48 = vsel %vm307_vm0, %v1300_v8, -inf }
 0x1b1   : > { %v968_v25 = vmul.f32 %v2858_v35, %v967_v42  ;;  %v1045_v42 = vsel %vm2884_vm13, %v2790_v16, %v1041_v56  ;;  %2033 = vrsqrt.f32 %v2898_v26  ;;  %vm903_vm4 = vweird.f32 %v2852_v9 }
 0x1b2   : > { %v899_v15 = vmul.f32 0.5, %v898_v41  ;;  %v751_v33 = vpop.xlane.xlu1 %750  ;;  %v890_v41 = vsub.f32 1.5, %v889_v45  ;;  %v1128_v56 = vmul.f32 %v2877_v3, %v1127_v10  ;;  %v1212_v45 = vmul.f32 %v1045_v42, %v2563_v39  ;;  %vm2962_vm8 = vmor %vm902_vm7, %vm903_vm4 }
 0x1b3   : > { %v969_v7 = vmul.f32 0.5, %v968_v25  ;;  %v727_v61 = vpop.xlane.xlu2 %726  ;;  %v823_v0 = vmul.f32 %v751_v33, %v2544_v31  ;;  %v1055_v39 = vsel %vm2927_vm3, %v2808_v28, %v1051_v51  ;;  %vm973_vm5 = vweird.f32 %v2858_v35 }
 0x1b4   : > { %v900_v46 = vsub.f32 1.5, %v899_v15  ;;  %v815_v6 = vmul.f32 %v727_v61, %v2544_v31  ;;  %v1220_v15 = vmul.f32 %v1125_v62, %v2566_v58  ;;  %v891_v37 = vmul.f32 %v2812_v54, %v890_v41  ;;  %vm2975_vm10 = vmor %vm972_vm9, %vm973_vm5 }
 0x1b5   : > { %v2907_v25 = vpop.eup %2029  ;;  %v970_v59 = vsub.f32 1.5, %v969_v7  ;;  %v2918_v5 = vadd.f32 1e-05, %v823_v0  ;;  %v1333_v10 = vrot.slane %v1332_v48, 4  ;;  %v2955_v51 = vmul.f32 %v2817_v49, %v1212_v45 }
 0x1b6   : > { %v1137_v16 = vmul.f32 %v2907_v25, %v2855_v11  ;;  %v2933_v29 = vpop.eup %2031  ;;  %v901_v58 = vmul.f32 %v2852_v9, %v900_v46  ;;  %v2940_v8 = vadd.f32 1e-05, %v815_v6  ;;  %v1129_v46 = vmul.f32 0.5, %v1128_v56 }
 0x1b7   : > { %v971_v55 = vmul.f32 %v2858_v35, %v970_v59  ;;  %2035 = vrsqrt.f32 %v2918_v5  ;;  %v1308_v6 = vmax.f32 %v1276_v44, 0.0  ;;  %v895_v28 = vsel %vm2949_vm6, %v2812_v54, %v891_v37  ;;  %v2969_v62 = vpop.eup %2033 }
 0x1b8   : > { %v1138_v7 = vmul.f32 %v2907_v25, %v1137_v16  ;;  %v1057_v12 = vmul.f32 %v2933_v29, %v2872_v20  ;;  %v1256_v41 = vmul.f32 %v2817_v49, %v1220_v15  ;;  %v1213_v0 = vmul.f32 %v1055_v39, %v2577_v14 }
 0x1b9   : > { %2037 = vrsqrt.f32 %v2940_v8  ;;  %v905_v32 = vsel %vm2962_vm8, %v2852_v9, %v901_v58  ;;  %v975_v59 = vsel %vm2975_vm10, %v2858_v35, %v971_v55  ;;  %v1334_v14 = vmax.f32 %v1332_v48, %v1333_v10 }
 0x1ba   : > { %v778_v63 = vpop.xlane.xlu1 %777  ;;  %v1139_v16 = vmul.f32 0.5, %v1138_v7  ;;  %v1197_v44 = vmul.f32 %v895_v28, %v2581_v19  ;;  %v1130_v56 = vsub.f32 1.5, %v1129_v46  ;;  %v1388_v45 = vsel %vm307_vm0, %v1308_v6, -inf  ;;  %v775_v6 = vpop.xlane.xlu0 %774 }
 0x1bb   : > { %v832_v15 = vmul.f32 %v778_v63, %v2544_v31  ;;  %vm1142_vm12 = vweird.f32 %v2855_v11  ;;  %v1058_v37 = vmul.f32 %v2933_v29, %v1057_v12  ;;  %v977_v9 = vmul.f32 %v2969_v62, %v2898_v26 }
 0x1bc   : > { %v1335_v39 = vrot.slane %v1334_v14, 2  ;;  %v1389_v35 = vrot.slane %v1388_v45, 4  ;;  %v2997_v48 = vmul.f32 %v2817_v49, %v1213_v0  ;;  %v1198_v19 = vmul.f32 %v905_v32, %v2596_v38  ;;  %v799_v38 = vpop.xlane.xlu2 %798 }
 0x1bd   : > { %v2990_v33 = vpop.eup %2035  ;;  %v1205_v58 = vmul.f32 %v975_v59, %v2599_v36  ;;  %v1140_v7 = vsub.f32 1.5, %v1139_v16  ;;  %v3003_v46 = vadd.f32 1e-05, %v832_v15  ;;  %v3008_v42 = vmul.f32 %v2817_v49, %v1197_v44 }
 0x1be   : > { %v987_v55 = vmul.f32 %v2990_v33, %v2918_v5  ;;  %v1336_v10 = vmax.f32 %v1334_v14, %v1335_v39  ;;  %v1390_v61 = vmax.f32 %v1388_v45, %v1389_v35  ;;  %v1131_v12 = vmul.f32 %v2877_v3, %v1130_v56 }
 0x1bf   : > { %v3005_v28 = vpop.eup %2037  ;;  %vm1133_vm13 = vweird.f32 %v2877_v3  ;;  %vm1143_vm14 = vweird.f32 %v2907_v25  ;;  %v1059_v36 = vmul.f32 0.5, %v1058_v37  ;;  %v978_v63 = vmul.f32 %v2969_v62, %v977_v9 }
 0x1c0   : > { %v907_v0 = vmul.f32 %v3005_v28, %v2940_v8  ;;  %v1337_v54 = vrot.slane %v1336_v10, 1  ;;  %vm1063_vm15 = vweird.f32 %v2933_v29  ;;  %v988_v32 = vmul.f32 %v2990_v33, %v987_v55  ;;  %vm3027_vm1 = vmor %vm1132_vm11, %vm1133_vm13 }
 0x1c1   : > { %v1391_v59 = vrot.slane %v1390_v61, 2  ;;  %2039 = vrsqrt.f32 %v3003_v46  ;;  %v3020_v16 = vmul.f32 %v2817_v49, %v1198_v19  ;;  %v3023_v14 = vmul.f32 %v2817_v49, %v1205_v58  ;;  %vm3048_vm3 = vmor %vm1142_vm12, %vm1143_vm14 }
 0x1c2   : > { %v1141_v56 = vmul.f32 %v2907_v25, %v1140_v7  ;;  %v3032_v45 = vmax.f32 %v1336_v10, %v1337_v54  ;;  %v1135_v15 = vsel %vm3027_vm1, %v2877_v3, %v1131_v12  ;;  %vm1062_vm2 = vweird.f32 %v2872_v20  ;;  %v733_v55 = vpop.xlane.xlu1 %732 }
 0x1c3   : > { %v908_v37 = vmul.f32 %v3005_v28, %v907_v0  ;;  %v1392_v9 = vmax.f32 %v1390_v61, %v1391_v59  ;;  %v831_v39 = vmul.f32 %v775_v6, %v2544_v31  ;;  %v1060_v57 = vsub.f32 1.5, %v1059_v36  ;;  %v730_v59 = vpop.xlane.xlu0 %729  ;;  %vm3090_vm9 = vmor %vm1062_vm2, %vm1063_vm15 }
 0x1c4   : > { %v979_v35 = vmul.f32 0.5, %v978_v63  ;;  %1663 = vrot.lane.b32.xlu1 %v3032_v45, %s2142_s17  ;;  %v839_v19 = vmul.f32 %v799_v38, %v2544_v31  ;;  %v1292_v58 = vadd.f32 %v2843_v2, %v1256_v41  ;;  %v989_v7 = vmul.f32 0.5, %v988_v32 }
 0x1c5   : > { %v1393_v10 = vrot.slane %v1392_v9, 1  ;;  %v3052_v61 = vadd.f32 1e-05, %v831_v39  ;;  %v1284_v6 = vadd.f32 %v2843_v2, %v2955_v51  ;;  %v1145_v41 = vsel %vm3048_vm3, %v2907_v25, %v1141_v56 }
 0x1c6   : > { %vm982_vm4 = vweird.f32 %v2898_v26  ;;  %vm983_vm5 = vweird.f32 %v2969_v62  ;;  %v3061_v11 = vadd.f32 1e-05, %v839_v19  ;;  %v1324_v12 = vmax.f32 %v1292_v58, 0.0 }
 0x1c7   : > { %v3063_v38 = vpop.eup %2039  ;;  %vm992_vm6 = vweird.f32 %v2918_v5  ;;  %v909_v36 = vmul.f32 0.5, %v908_v37  ;;  %v3066_v63 = vmax.f32 %v1392_v9, %v1393_v10  ;;  %2041 = vrsqrt.f32 %v3052_v61  ;;  %v754_v9 = vpop.xlane.xlu2 %753  ;;  %vm3114_vm11 = vmor %vm982_vm4, %vm983_vm5 }
 0x1c8   : > { %v817_v51 = vmul.f32 %v733_v55, %v2544_v31  ;;  %v1221_v25 = vmul.f32 %v1135_v15, %v2589_v27  ;;  %v1061_v0 = vmul.f32 %v2933_v29, %v1060_v57  ;;  %v980_v54 = vsub.f32 1.5, %v979_v35 }
 0x1c9   : > { %v1077_v32 = vmul.f32 %v3063_v38, %v3003_v46  ;;  %v990_v44 = vsub.f32 1.5, %v989_v7  ;;  %vm912_vm7 = vweird.f32 %v2940_v8  ;;  %1679 = vrot.lane.b32.xlu0 %v3066_v63, %s2142_s17  ;;  %2043 = vrsqrt.f32 %v3061_v11 }
 0x1ca   : > { %v1500_v56 = vsel %vm307_vm0, %v1324_v12, -inf  ;;  %v1316_v37 = vmax.f32 %v1284_v6, 0.0  ;;  %v1222_v27 = vmul.f32 %v1145_v41, %v2608_v50  ;;  %vm993_vm8 = vweird.f32 %v2990_v33 }
 0x1cb   : > { %v1078_v15 = vmul.f32 %v3063_v38, %v1077_v32  ;;  %v1501_v39 = vrot.slane %v1500_v56, 4  ;;  %v910_v57 = vsub.f32 1.5, %v909_v36  ;;  %v3083_v19 = vadd.f32 1e-05, %v817_v51  ;;  %vm3130_vm12 = vmor %vm992_vm6, %vm993_vm8 }
 0x1cc   : > { %v1444_v35 = vsel %vm307_vm0, %v1316_v37, -inf  ;;  %v816_v58 = vmul.f32 %v730_v59, %v2544_v31  ;;  %v981_v50 = vmul.f32 %v2969_v62, %v980_v54  ;;  %v824_v10 = vmul.f32 %v754_v9, %v2544_v31 }
 0x1cd   : > { %v1502_v3 = vmax.f32 %v1500_v56, %v1501_v39  ;;  %v1445_v7 = vrot.slane %v1444_v35, 4  ;;  %v3096_v6 = vpop.eup %2041  ;;  %v1065_v41 = vsel %vm3090_vm9, %v2933_v29, %v1061_v0  ;;  %v991_v12 = vmul.f32 %v2990_v33, %v990_v44 }
 0x1ce   : > { %2045 = vrsqrt.f32 %v3083_v19  ;;  %v3103_v20 = vadd.f32 1e-05, %v816_v58  ;;  %vm913_vm10 = vweird.f32 %v3005_v28  ;;  %v1079_v36 = vmul.f32 0.5, %v1078_v15 }
 0x1cf   : > { %v1067_v51 = vmul.f32 %v3096_v6, %v3052_v61  ;;  %v1503_v54 = vrot.slane %v1502_v3, 2  ;;  %v3108_v32 = vpop.eup %2043  ;;  %v911_v0 = vmul.f32 %v3005_v28, %v910_v57  ;;  %v1446_v59 = vmax.f32 %v1444_v35, %v1445_v7  ;;  %vm3148_vm13 = vmor %vm912_vm7, %vm913_vm10 }
 0x1d0   : > { %2047 = vrsqrt.f32 %v3103_v20  ;;  %v3120_v44 = vadd.f32 1e-05, %v824_v10  ;;  %v1214_v56 = vmul.f32 %v1065_v41, %v2622_v4  ;;  %v985_v37 = vsel %vm3114_vm11, %v2969_v62, %v981_v50 }
 0x1d1   : > { %v1068_v9 = vmul.f32 %v3096_v6, %v1067_v51  ;;  %v1147_v15 = vmul.f32 %v3108_v32, %v3061_v11  ;;  %v995_v4 = vsel %vm3130_vm12, %v2990_v33, %v991_v12  ;;  %v1504_v39 = vmax.f32 %v1502_v3, %v1503_v54 }
 0x1d2   : > { %v1447_v57 = vrot.slane %v1446_v59, 2  ;;  %2049 = vrsqrt.f32 %v3120_v44  ;;  %v3142_v62 = vmul.f32 %v2817_v49, %v1221_v25  ;;  %v1080_v35 = vsub.f32 1.5, %v1079_v36 }
 0x1d3   : > { %v1069_v58 = vmul.f32 0.5, %v1068_v9  ;;  %v1285_v33 = vadd.f32 %v2843_v2, %v2997_v48  ;;  %v3157_v50 = vmul.f32 %v2817_v49, %v1222_v27  ;;  %v915_v25 = vsel %vm3148_vm13, %v3005_v28, %v911_v0 }
 0x1d4   : > { %v3154_v55 = vpop.eup %2045  ;;  %v1505_v3 = vrot.slane %v1504_v39, 1  ;;  %v1448_v8 = vmax.f32 %v1446_v59, %v1447_v57  ;;  %v3163_v7 = vmul.f32 %v2817_v49, %v1214_v56  ;;  %v1206_v10 = vmul.f32 %v985_v37, %v2617_v1 }
 0x1d5   : > { %v1207_v41 = vmul.f32 %v995_v4, %v2629_v13  ;;  %v1148_v48 = vmul.f32 %v3108_v32, %v1147_v15  ;;  %vm1083_vm14 = vweird.f32 %v3063_v38  ;;  %v1317_v51 = vmax.f32 %v1285_v33, 0.0  ;;  %v805_v4 = vpop.xlane.xlu1 %804 }
 0x1d6   : > { %v3168_v12 = vpop.eup %2047  ;;  %v3171_v27 = vmax.f32 %v1504_v39, %v1505_v3  ;;  %v1449_v36 = vrot.slane %v1448_v8, 1  ;;  %v1199_v28 = vmul.f32 %v915_v25, %v2636_v23  ;;  %v1081_v54 = vmul.f32 %v3063_v38, %v1080_v35  ;;  %v802_v3 = vpop.xlane.xlu0 %801 }
 0x1d7   : > { %v1070_v29 = vsub.f32 1.5, %v1069_v58  ;;  %v927_v1 = vmul.f32 %v3154_v55, %v3083_v19  ;;  %v917_v59 = vmul.f32 %v3168_v12, %v3103_v20  ;;  %v1451_v56 = vsel %vm307_vm0, %v1317_v51, -inf }
 0x1d8   : > { %v3177_v0 = vpop.eup %2049  ;;  %1711 = vrot.lane.b32.xlu2 %v3171_v27, %s2142_s17  ;;  %v3181_v13 = vmax.f32 %v1448_v8, %v1449_v36  ;;  %v1269_v23 = vadd.f32 %v2843_v2, %v3008_v42  ;;  %v3189_v37 = vmul.f32 %v2817_v49, %v1206_v10  ;;  %vm1082_vm15 = vweird.f32 %v3003_v46 }
 0x1d9   : > { %vm1072_vm1 = vweird.f32 %v3052_v61  ;;  %v1149_v26 = vmul.f32 0.5, %v1148_v48  ;;  %v3194_v9 = vmul.f32 %v2817_v49, %v1207_v41  ;;  %vm3198_vm2 = vmor %vm1082_vm15, %vm1083_vm14  ;;  %vm1073_vm3 = vweird.f32 %v3096_v6 }
 0x1da   : > { %1695 = vrot.lane.b32.xlu1 %v3181_v13, %s2142_s17  ;;  %v997_v46 = vmul.f32 %v3177_v0, %v3120_v44  ;;  %v1452_v42 = vrot.slane %v1451_v56, 4  ;;  %v1085_v39 = vsel %vm3198_vm2, %v3063_v38, %v1081_v54  ;;  %v1071_v57 = vmul.f32 %v3096_v6, %v1070_v29  ;;  %vm3226_vm6 = vmor %vm1072_vm1, %vm1073_vm3 }
 0x1db   : > { %vm1152_vm4 = vweird.f32 %v3061_v11  ;;  %v928_v5 = vmul.f32 %v3154_v55, %v927_v1  ;;  %v1301_v35 = vmax.f32 %v1269_v23, 0.0  ;;  %v3214_v58 = vmul.f32 %v2817_v49, %v1199_v28  ;;  %v781_v23 = vpop.xlane.xlu2 %780 }
 0x1dc   : > { %vm1153_vm5 = vweird.f32 %v3108_v32  ;;  %v918_v33 = vmul.f32 %v3168_v12, %v917_v59  ;;  %v1453_v25 = vmax.f32 %v1451_v56, %v1452_v42  ;;  %v1150_v8 = vsub.f32 1.5, %v1149_v26 }
 0x1dd   : > { %v998_v10 = vmul.f32 %v3177_v0, %v997_v46  ;;  %v1339_v38 = vsel %vm307_vm0, %v1301_v35, -inf  ;;  %v841_v41 = vmul.f32 %v805_v4, %v2544_v31  ;;  %v1216_v48 = vmul.f32 %v1085_v39, %v2652_v52  ;;  %vm3254_vm12 = vmor %vm1152_vm4, %vm1153_vm5  ;;  %v760_v36 = vpop.xlane.xlu1 %759 }
 0x1de   : > { %v1454_v51 = vrot.slane %v1453_v25, 2  ;;  %vm1588_vm7 = vcmask 1041409   ;;  %v1340_v28 = vrot.slane %v1339_v38, 4  ;;  %v1075_v54 = vsel %vm3226_vm6, %v3096_v6, %v1071_v57 }
 0x1df   : > { %v929_v29 = vmul.f32 0.5, %v928_v5  ;;  %v3233_v1 = vadd.f32 1e-05, %v841_v41  ;;  %v840_v52 = vmul.f32 %v802_v3, %v2544_v31  ;;  %vm933_vm8 = vweird.f32 %v3154_v55 }
 0x1e0   : > { %v919_v59 = vmul.f32 0.5, %v918_v33  ;;  %v1455_v61 = vmax.f32 %v1453_v25, %v1454_v51  ;;  %v1341_v56 = vmax.f32 %v1339_v38, %v1340_v28  ;;  %v1151_v26 = vmul.f32 %v3108_v32, %v1150_v8 }
 0x1e1   : > { %v999_v15 = vmul.f32 0.5, %v998_v10  ;;  %2051 = vrsqrt.f32 %v3233_v1  ;;  %v3239_v46 = vadd.f32 1e-05, %v840_v52  ;;  %v3242_v6 = vmul.f32 %v2817_v49, %v1216_v48 }
 0x1e2   : > { %v1215_v42 = vmul.f32 %v1075_v54, %v2655_v53  ;;  %vm932_vm9 = vweird.f32 %v3083_v19  ;;  %vm923_vm10 = vweird.f32 %v3168_v12  ;;  %v1456_v4 = vrot.slane %v1455_v61, 1 }
 0x1e3   : > { %v930_v39 = vsub.f32 1.5, %v929_v29  ;;  %vm922_vm11 = vweird.f32 %v3103_v20  ;;  %v1342_v57 = vrot.slane %v1341_v56, 2  ;;  %2053 = vrsqrt.f32 %v3239_v46  ;;  %vm3299_vm15 = vmor %vm932_vm9, %vm933_vm8 }
 0x1e4   : > { %v833_v5 = vmul.f32 %v781_v23, %v2544_v31  ;;  %v920_v53 = vsub.f32 1.5, %v919_v59  ;;  %vm1002_vm13 = vweird.f32 %v3120_v44  ;;  %vm1003_vm14 = vweird.f32 %v3177_v0  ;;  %vm3314_vm1 = vmor %vm922_vm11, %vm923_vm10 }
 0x1e5   : > { %v1457_v33 = vmax.f32 %v1455_v61, %v1456_v4  ;;  %v1270_v25 = vadd.f32 %v2843_v2, %v3020_v16  ;;  %v1155_v3 = vsel %vm3254_vm12, %v3108_v32, %v1151_v26  ;;  %v1000_v8 = vsub.f32 1.5, %v999_v15  ;;  %vm3330_vm2 = vmor %vm1002_vm13, %vm1003_vm14  ;;  %v787_v20 = vpop.xlane.xlu1 %786 }
 0x1e6   : > { %v1343_v10 = vmax.f32 %v1341_v56, %v1342_v57  ;;  %v3265_v11 = vadd.f32 1e-05, %v833_v5  ;;  %v1277_v48 = vadd.f32 %v2843_v2, %v3023_v14  ;;  %v1293_v16 = vadd.f32 %v2843_v2, %v3142_v62 }
 0x1e7   : > { %1697 = vrot.lane.b32.xlu0 %v1457_v33, %s2142_s17  ;;  %v3270_v38 = vsel %vm1588_vm7, %v1457_v33, %v3181_v13  ;;  %v1302_v41 = vmax.f32 %v1270_v25, 0.0  ;;  %v3276_v51 = vpop.eup %2051  ;;  %v3279_v32 = vmul.f32 %v2817_v49, %v1215_v42  ;;  %v931_v28 = vmul.f32 %v3154_v55, %v930_v39  ;;  %v757_v39 = vpop.xlane.xlu0 %756 }
 0x1e8   : > { %v1344_v54 = vrot.slane %v1343_v10, 1  ;;  %2055 = vrsqrt.f32 %v3265_v11  ;;  %v921_v13 = vmul.f32 %v3168_v12, %v920_v53  ;;  %v1167_v29 = vmul.f32 %v3276_v51, %v3233_v1  ;;  %v736_v33 = vpop.xlane.xlu2 %735 }
 0x1e9   : > { %v1346_v14 = vsel %vm307_vm0, %v1302_v41, -inf  ;;  %v1309_v52 = vmax.f32 %v1277_v48, 0.0  ;;  %v3287_v62 = vpop.eup %2053  ;;  %v1325_v56 = vmax.f32 %v1293_v16, 0.0  ;;  %v826_v23 = vmul.f32 %v760_v36, %v2544_v31 }
 0x1ea   : > { %v1345_v59 = vmax.f32 %v1343_v10, %v1344_v54  ;;  %v1347_v61 = vrot.slane %v1346_v14, 4  ;;  %v1223_v26 = vmul.f32 %v1155_v3, %v2645_v30  ;;  %v1001_v15 = vmul.f32 %v3177_v0, %v1000_v8 }
 0x1eb   : > { %v1157_v42 = vmul.f32 %v3287_v62, %v3239_v46  ;;  %v1395_v4 = vsel %vm307_vm0, %v1309_v52, -inf  ;;  %v1507_v53 = vsel %vm307_vm0, %v1325_v56, -inf  ;;  %v935_v25 = vsel %vm3299_vm15, %v3154_v55, %v931_v28 }
 0x1ec   : > { %1665 = vrot.lane.b32.xlu2 %v1345_v59, %s2142_s17  ;;  %v1589_v30 = vsel %vm1588_vm7, %v1345_v59, %v3032_v45  ;;  %v1348_v5 = vmax.f32 %v1346_v14, %v1347_v61  ;;  %v1396_v35 = vrot.slane %v1395_v4, 4  ;;  %v1168_v3 = vmul.f32 %v3276_v51, %v1167_v29 }
 0x1ed   : > { %v1508_v45 = vrot.slane %v1507_v53, 4  ;;  %v3319_v8 = vadd.f32 1e-05, %v826_v23  ;;  %v925_v41 = vsel %vm3314_vm1, %v3168_v12, %v921_v13  ;;  %v825_v16 = vmul.f32 %v757_v39, %v2544_v31 }
 0x1ee   : > { %v3321_v10 = vpop.eup %2055  ;;  %v1349_v55 = vrot.slane %v1348_v5, 2  ;;  %v1397_v48 = vmax.f32 %v1395_v4, %v1396_v35  ;;  %v1005_v36 = vsel %vm3330_vm2, %v3177_v0, %v1001_v15  ;;  %v1158_v28 = vmul.f32 %v3287_v62, %v1157_v42 }
 0x1ef   : > { %v1087_v12 = vmul.f32 %v3321_v10, %v3265_v11  ;;  %v818_v54 = vmul.f32 %v736_v33, %v2544_v31  ;;  %v1509_v29 = vmax.f32 %v1507_v53, %v1508_v45  ;;  %2057 = vrsqrt.f32 %v3319_v8 }
 0x1f0   : > { %v1350_v44 = vmax.f32 %v1348_v5, %v1349_v55  ;;  %v1398_v13 = vrot.slane %v1397_v48, 2  ;;  %v3344_v14 = vmul.f32 %v2817_v49, %v1223_v26  ;;  %v1201_v52 = vmul.f32 %v935_v25, %v2675_v17 }
 0x1f1   : > { %v1200_v59 = vmul.f32 %v925_v41, %v2665_v40  ;;  %v1169_v0 = vmul.f32 0.5, %v1168_v3  ;;  %v1510_v23 = vrot.slane %v1509_v29, 2  ;;  %v3348_v15 = vadd.f32 1e-05, %v825_v16 }
 0x1f2   : > { %v1351_v61 = vrot.slane %v1350_v44, 1  ;;  %v1399_v56 = vmax.f32 %v1397_v48, %v1398_v13  ;;  %v1208_v42 = vmul.f32 %v1005_v36, %v2670_v24  ;;  %v1159_v4 = vmul.f32 0.5, %v1158_v28 }
 0x1f3   : > { %v1088_v39 = vmul.f32 %v3321_v10, %v1087_v12  ;;  %vm1590_vm3 = vcmask 1042434   ;;  %v1511_v26 = vmax.f32 %v1509_v29, %v1510_v23  ;;  %v3352_v35 = vadd.f32 1e-05, %v818_v54 }
 0x1f4   : > { %v1352_v57 = vmax.f32 %v1350_v44, %v1351_v61  ;;  %v1400_v5 = vrot.slane %v1399_v56, 1  ;;  %v3355_v17 = vmul.f32 %v2817_v49, %v1201_v52  ;;  %vm1172_vm4 = vweird.f32 %v3233_v1 }
 0x1f5   : > { %vm1162_vm5 = vweird.f32 %v3239_v46  ;;  %2059 = vrsqrt.f32 %v3348_v15  ;;  %v3360_v40 = vpop.eup %2057  ;;  %v3363_v24 = vmul.f32 %v2817_v49, %v1200_v59  ;;  %v1170_v53 = vsub.f32 1.5, %v1169_v0 }
 0x1f6   : > { %1667 = vrot.lane.b32.xlu0 %v1352_v57, %s2142_s17  ;;  %v3367_v33 = vsel %vm1590_vm3, %v1352_v57, %v1589_v30  ;;  %v1401_v25 = vmax.f32 %v1399_v56, %v1400_v5  ;;  %v3370_v19 = vmul.f32 %v2817_v49, %v1208_v42  ;;  %v1160_v3 = vsub.f32 1.5, %v1159_v4  ;;  %v784_v30 = vpop.xlane.xlu0 %783 }
 0x1f7   : > { %v1512_v45 = vrot.slane %v1511_v26, 1  ;;  %v1017_v41 = vmul.f32 %v3360_v40, %v3319_v8  ;;  %vm1173_vm6 = vweird.f32 %v3276_v51  ;;  %v1089_v55 = vmul.f32 0.5, %v1088_v39 }
 0x1f8   : > { %v3377_v48 = vsel %vm1588_vm7, %v1401_v25, %v3066_v63  ;;  %1681 = vrot.lane.b32.xlu2 %v1401_v25, %s2142_s17  ;;  %2061 = vrsqrt.f32 %v3352_v35  ;;  %vm1163_vm8 = vweird.f32 %v3287_v62  ;;  %v1294_v28 = vadd.f32 %v2843_v2, %v3157_v50  ;;  %vm3408_vm11 = vmor %vm1172_vm4, %vm1173_vm6 }
 0x1f9   : > { %v1513_v16 = vmax.f32 %v1511_v26, %v1512_v45  ;;  %v1018_v36 = vmul.f32 %v3360_v40, %v1017_v41  ;;  %v1171_v12 = vmul.f32 %v3276_v51, %v1170_v53  ;;  %vm1092_vm9 = vweird.f32 %v3265_v11 }
 0x1fa   : > { %v1286_v63 = vadd.f32 %v2843_v2, %v3163_v7  ;;  %v1278_v54 = vadd.f32 %v2843_v2, %v3189_v37  ;;  %v835_v44 = vmul.f32 %v787_v20, %v2544_v31  ;;  %v1161_v29 = vmul.f32 %v3287_v62, %v1160_v3 }
 0x1fb   : > { %v3392_v13 = vpop.eup %2059  ;;  %1713 = vrot.lane.b32.xlu1 %v1513_v16, %s2142_s17  ;;  %v3398_v50 = vsel %vm1588_vm7, %v1513_v16, %v3171_v27  ;;  %v1326_v52 = vmax.f32 %v1294_v28, 0.0  ;;  %v834_v59 = vmul.f32 %v784_v30, %v2544_v31  ;;  %v1090_v0 = vsub.f32 1.5, %v1089_v55  ;;  %vm3424_vm7 = vmor %vm1162_vm5, %vm1163_vm8 }
 0x1fc   : > { %vm1093_vm10 = vweird.f32 %v3321_v10  ;;  %v1007_v7 = vmul.f32 %v3392_v13, %v3348_v15  ;;  %v1318_v37 = vmax.f32 %v1286_v63, 0.0  ;;  %v1019_v27 = vmul.f32 0.5, %v1018_v36  ;;  %v808_v36 = vpop.xlane.xlu2 %807 }
 0x1fd   : > { %v1514_v56 = vsel %vm307_vm0, %v1326_v52, -inf  ;;  %v1310_v23 = vmax.f32 %v1278_v54, 0.0  ;;  %v3413_v42 = vadd.f32 1e-05, %v835_v44  ;;  %v1175_v39 = vsel %vm3408_vm11, %v3276_v51, %v1171_v12  ;;  %vm3447_vm12 = vmor %vm1092_vm9, %vm1093_vm10 }
 0x1fe   : > { %v3415_v4 = vpop.eup %2061  ;;  %v1008_v57 = vmul.f32 %v3392_v13, %v1007_v7  ;;  %v1515_v5 = vrot.slane %v1514_v56, 4  ;;  %v1458_v26 = vsel %vm307_vm0, %v1318_v37, -inf  ;;  %v1165_v53 = vsel %vm3424_vm7, %v3287_v62, %v1161_v29 }
 0x1ff   : > { %v937_v51 = vmul.f32 %v3415_v4, %v3352_v35  ;;  %v1459_v25 = vrot.slane %v1458_v26, 4  ;;  %v3435_v3 = vadd.f32 1e-05, %v834_v59  ;;  %v1091_v46 = vmul.f32 %v3321_v10, %v1090_v0 }
 0x200   : > { %v1516_v45 = vmax.f32 %v1514_v56, %v1515_v5  ;;  %v1402_v41 = vsel %vm307_vm0, %v1310_v23, -inf  ;;  %2063 = vrsqrt.f32 %v3413_v42  ;;  %v1020_v20 = vsub.f32 1.5, %v1019_v27 }
 0x201   : > { %v938_v55 = vmul.f32 %v3415_v4, %v937_v51  ;;  %v1460_v30 = vmax.f32 %v1458_v26, %v1459_v25  ;;  %v1403_v16 = vrot.slane %v1402_v41, 4  ;;  %v1225_v62 = vmul.f32 %v1175_v39, %v2696_v34 }
 0x202   : > { %v1224_v28 = vmul.f32 %v1165_v53, %v2686_v21  ;;  %v1009_v12 = vmul.f32 0.5, %v1008_v57  ;;  %v1517_v63 = vrot.slane %v1516_v45, 2  ;;  %vm1022_vm13 = vweird.f32 %v3319_v8 }
 0x203   : > { %v1461_v44 = vrot.slane %v1460_v30, 2  ;;  %v1404_v29 = vmax.f32 %v1402_v41, %v1403_v16  ;;  %2065 = vrsqrt.f32 %v3435_v3  ;;  %v1095_v21 = vsel %vm3447_vm12, %v3321_v10, %v1091_v46  ;;  %v739_v16 = vpop.xlane.xlu0 %738 }
 0x204   : > { %vm1023_vm14 = vweird.f32 %v3360_v40  ;;  %vm1012_vm15 = vweird.f32 %v3348_v15  ;;  %v939_v34 = vmul.f32 0.5, %v938_v55  ;;  %v1518_v11 = vmax.f32 %v1516_v45, %v1517_v63 }
 0x205   : > { %v1021_v52 = vmul.f32 %v3360_v40, %v1020_v20  ;;  %v1462_v59 = vmax.f32 %v1460_v30, %v1461_v44  ;;  %v1405_v0 = vrot.slane %v1404_v29, 2  ;;  %v842_v7 = vmul.f32 %v808_v36, %v2544_v31  ;;  %vm3474_vm2 = vmor %vm1022_vm13, %vm1023_vm14  ;;  %v763_v36 = vpop.xlane.xlu2 %762 }
 0x206   : > { %v3460_v37 = vpop.eup %2063  ;;  %v3463_v61 = vmul.f32 %v2817_v49, %v1225_v62  ;;  %v3466_v27 = vmul.f32 %v2817_v49, %v1224_v28  ;;  %v1010_v10 = vsub.f32 1.5, %v1009_v12  ;;  %v1519_v56 = vrot.slane %v1518_v11, 1 }
 0x207   : > { %v1217_v23 = vmul.f32 %v1095_v21, %v2691_v22  ;;  %vm1013_vm1 = vweird.f32 %v3392_v13  ;;  %v1463_v39 = vrot.slane %v1462_v59, 1  ;;  %v1406_v1 = vmax.f32 %v1404_v29, %v1405_v0 }
 0x208   : > { %v940_v5 = vsub.f32 1.5, %v939_v34  ;;  %v1520_v26 = vmax.f32 %v1518_v11, %v1519_v56  ;;  %v1107_v53 = vmul.f32 %v3460_v37, %v3413_v42  ;;  %v3480_v51 = vadd.f32 1e-05, %v842_v7  ;;  %vm3515_vm6 = vmor %vm1012_vm15, %vm1013_vm1 }
 0x209   : > { %v3482_v22 = vpop.eup %2065  ;;  %v1025_v25 = vsel %vm3474_vm2, %v3360_v40, %v1021_v52  ;;  %v1464_v46 = vmax.f32 %v1462_v59, %v1463_v39  ;;  %v1407_v45 = vrot.slane %v1406_v1, 1  ;;  %v1279_v8 = vadd.f32 %v2843_v2, %v3194_v9 }
 0x20a   : > { %v1011_v41 = vmul.f32 %v3392_v13, %v1010_v10  ;;  %1715 = vrot.lane.b32.xlu0 %v1520_v26, %s2142_s17  ;;  %v3493_v20 = vsel %vm1590_vm3, %v1520_v26, %v3398_v50  ;;  %v1108_v55 = vmul.f32 %v3460_v37, %v1107_v53  ;;  %v1097_v30 = vmul.f32 %v3482_v22, %v3435_v3  ;;  %v3553_v10 = vld [vmem:[%s3962_s3] ss:$0 sm:$0xff] }
 0x20b   : > { %vm942_vm4 = vweird.f32 %v3352_v35  ;;  %v3501_v40 = vsel %vm1590_vm3, %v1464_v46, %v3270_v38  ;;  %1699 = vrot.lane.b32.xlu2 %v1464_v46, %s2142_s17  ;;  %v1408_v9 = vmax.f32 %v1406_v1, %v1407_v45  ;;  %2067 = vrsqrt.f32 %v3480_v51 }
 0x20c   : > { %v3506_v50 = vmul.f32 %v2817_v49, %v1217_v23  ;;  %v941_v62 = vmul.f32 %v3415_v4, %v940_v5  ;;  %vm943_vm5 = vweird.f32 %v3415_v4  ;;  %v1109_v28 = vmul.f32 0.5, %v1108_v55 }
 0x20d   : > { %v1210_v12 = vmul.f32 %v1025_v25, %v2717_v47  ;;  %1683 = vrot.lane.b32.xlu1 %v1408_v9, %s2142_s17  ;;  %v1311_v63 = vmax.f32 %v1279_v8, 0.0  ;;  %v1271_v49 = vadd.f32 %v2843_v2, %v3214_v58  ;;  %v819_v54 = vmul.f32 %v739_v16, %v2544_v31  ;;  %vm3532_vm8 = vmor %vm942_vm4, %vm943_vm5 }
 0x20e   : > { %v1015_v47 = vsel %vm3515_vm6, %v3392_v13, %v1011_v41  ;;  %v1098_v44 = vmul.f32 %v3482_v22, %v1097_v30  ;;  %v827_v15 = vmul.f32 %v763_v36, %v2544_v31  ;;  %v1288_v29 = vadd.f32 %v2843_v2, %v3242_v6 }
 0x20f   : > { %vm1112_vm9 = vweird.f32 %v3413_v42  ;;  %v1409_v58 = vsel %vm307_vm0, %v1311_v63, -inf  ;;  %v1303_v34 = vmax.f32 %v1271_v49, 0.0  ;;  %v3538_v11 = vadd.f32 1e-05, %v819_v54 }
 0x210   : > { %v945_v13 = vsel %vm3532_vm8, %v3415_v4, %v941_v62  ;;  %v1110_v52 = vsub.f32 1.5, %v1109_v28  ;;  %v1410_v59 = vrot.slane %v1409_v58, 4  ;;  %v3543_v2 = vadd.f32 1e-05, %v827_v15 }
 0x211   : > { %v3545_v6 = vpop.eup %2067  ;;  %v1209_v35 = vmul.f32 %v1015_v47, %v2707_v43  ;;  %v1353_v0 = vsel %vm307_vm0, %v1303_v34, -inf  ;;  %2069 = vrsqrt.f32 %v3538_v11  ;;  %v1320_v7 = vmax.f32 %v1288_v29, 0.0  ;;  %v3563_v43 = vld [vmem:[%s3963_s4] ss:$0 sm:$0xff] }
 0x212   : > { %v3556_v4 = vmul.f32 %v3553_v10, %v1210_v12  ;;  %v1099_v56 = vmul.f32 0.5, %v1098_v44  ;;  %v1177_v23 = vmul.f32 %v3545_v6, %v3480_v51  ;;  %v1287_v39 = vadd.f32 %v3563_v43, %v3279_v32 }
 0x213   : > { %v1202_v1 = vmul.f32 %v945_v13, %v2712_v18  ;;  %v1411_v57 = vmax.f32 %v1409_v58, %v1410_v59  ;;  %v1354_v5 = vrot.slane %v1353_v0, 4  ;;  %2071 = vrsqrt.f32 %v3543_v2 }
 0x214   : > { %v1111_v26 = vmul.f32 %v3460_v37, %v1110_v52  ;;  %vm1113_vm10 = vweird.f32 %v3460_v37  ;;  %v1178_v53 = vmul.f32 %v3545_v6, %v1177_v23  ;;  %v1472_v25 = vsel %vm307_vm0, %v1320_v7, -inf }
 0x215   : > { %v3574_v46 = vmul.f32 %v3553_v10, %v1209_v35  ;;  %vm1102_vm11 = vweird.f32 %v3435_v3  ;;  %vm1103_vm7 = vweird.f32 %v3482_v22  ;;  %v1412_v18 = vrot.slane %v1411_v57, 2  ;;  %vm3593_vm12 = vmor %vm1112_vm9, %vm1113_vm10 }
 0x216   : > { %v1355_v32 = vmax.f32 %v1353_v0, %v1354_v5  ;;  %v1100_v45 = vsub.f32 1.5, %v1099_v56  ;;  %v1473_v8 = vrot.slane %v1472_v25, 4  ;;  %v1319_v41 = vmax.f32 %v1287_v39, 0.0  ;;  %vm3626_vm15 = vmor %vm1102_vm11, %vm1103_vm7 }
 0x217   : > { %v1295_v55 = vadd.f32 %v3563_v43, %v3344_v14  ;;  %v3580_v30 = vpop.eup %2069  ;;  %v3583_v16 = vmul.f32 %v3553_v10, %v1202_v1  ;;  %v3587_v36 = vsel %vm1590_vm3, %v1408_v9, %v3377_v48  ;;  %v1413_v28 = vmax.f32 %v1411_v57, %v1412_v18  ;;  %v811_v14 = vpop.xlane.xlu0 %810 }
 0x218   : > { %v1356_v12 = vrot.slane %v1355_v32, 2  ;;  %v1115_v38 = vsel %vm3593_vm12, %v3460_v37, %v1111_v26  ;;  %v1179_v63 = vmul.f32 0.5, %v1178_v53  ;;  %v947_v48 = vmul.f32 %v3580_v30, %v3538_v11 }
 0x219   : > { %v1474_v9 = vmax.f32 %v1472_v25, %v1473_v8  ;;  %v3602_v49 = vpop.eup %2071  ;;  %v1414_v54 = vrot.slane %v1413_v28, 1  ;;  %v1465_v47 = vsel %vm307_vm0, %v1319_v41, -inf  ;;  %v1327_v44 = vmax.f32 %v1295_v55, 0.0 }
 0x21a   : > { %v1357_v42 = vmax.f32 %v1355_v32, %v1356_v12  ;;  %v1101_v15 = vmul.f32 %v3482_v22, %v1100_v45  ;;  %vm1182_vm3 = vweird.f32 %v3480_v51  ;;  %v948_v29 = vmul.f32 %v3580_v30, %v947_v48 }
 0x21b   : > { %v1027_v37 = vmul.f32 %v3602_v49, %v3543_v2  ;;  %v843_v21 = vmul.f32 %v811_v14, %v2544_v31  ;;  %v3611_v58 = vmax.f32 %v1413_v28, %v1414_v54  ;;  %v1475_v13 = vrot.slane %v1474_v9, 2  ;;  %v4032_v28 = vld [vmem:[#allocation5_spill] sm:$0xff] }
 0x21c   : > { %v1358_v34 = vrot.slane %v1357_v42, 1  ;;  %v1466_v52 = vrot.slane %v1465_v47, 4  ;;  %v1180_v59 = vsub.f32 1.5, %v1179_v63  ;;  %v949_v35 = vmul.f32 0.5, %v948_v29 }
 0x21d   : > { %v1028_v0 = vmul.f32 %v3602_v49, %v1027_v37  ;;  %v1521_v7 = vsel %vm307_vm0, %v1327_v44, -inf  ;;  %vm1183_vm13 = vweird.f32 %v3545_v6  ;;  %1685 = vrot.lane.b32.xlu0 %v3611_v58, %s2142_s17  ;;  %vm952_vm14 = vweird.f32 %v3538_v11 }
 0x21e   : > { %v3618_v56 = vmax.f32 %v1357_v42, %v1358_v34  ;;  %v1476_v31 = vmax.f32 %v1474_v9, %v1475_v13  ;;  %v1219_v23 = vmul.f32 %v1115_v38, %v2738_v60  ;;  %v950_v1 = vsub.f32 1.5, %v949_v35  ;;  %vm3656_vm4 = vmor %vm1182_vm3, %vm1183_vm13  ;;  %v4037_v13 = vld [vmem:[#allocation6_spill] sm:$0xff] }
 0x21f   : > { %v1467_v57 = vmax.f32 %v1465_v47, %v1466_v52  ;;  %v1522_v5 = vrot.slane %v1521_v7, 4  ;;  %v1105_v26 = vsel %vm3626_vm15, %v3482_v22, %v1101_v15  ;;  %v1029_v53 = vmul.f32 0.5, %v1028_v0 }
 0x220   : > { %1669 = vrot.lane.b32.xlu2 %v3618_v56, %s2142_s17  ;;  %v1477_v60 = vrot.slane %v1476_v31, 1  ;;  %v3635_v25 = vadd.f32 1e-05, %v843_v21  ;;  %v1181_v3 = vmul.f32 %v3545_v6, %v1180_v59  ;;  %vm953_vm1 = vweird.f32 %v3580_v30 }
 0x221   : > { %v1468_v18 = vrot.slane %v1467_v57, 2  ;;  %v1523_v32 = vmax.f32 %v1521_v7, %v1522_v5  ;;  %v951_v45 = vmul.f32 %v3580_v30, %v950_v1  ;;  %v1273_v22 = vadd.f32 %v3563_v43, %v3355_v17  ;;  %vm3666_vm5 = vmor %vm952_vm14, %vm953_vm1 }
 0x222   : > { %v3640_v8 = vmax.f32 %v1476_v31, %v1477_v60  ;;  %2073 = vrsqrt.f32 %v3635_v25  ;;  %v3646_v41 = vmul.f32 %v3553_v10, %v1219_v23  ;;  %vm1032_vm2 = vweird.f32 %v3543_v2  ;;  %v4038_v23 = vld [vmem:[#allocation7_spill] sm:$0xff] }
 0x223   : > { %v1469_v55 = vmax.f32 %v1467_v57, %v1468_v18  ;;  %v1524_v62 = vrot.slane %v1523_v32, 2  ;;  %v3650_v12 = vmul.f32 %v1105_v26, %v4032_v28  ;;  %v1030_v38 = vsub.f32 1.5, %v1029_v53 }
 0x224   : > { %v1305_v17 = vmax.f32 %v1273_v22, 0.0  ;;  %v1272_v63 = vadd.f32 %v3563_v43, %v3363_v24  ;;  %vm1033_vm6 = vweird.f32 %v3602_v49  ;;  %v1280_v54 = vadd.f32 %v3563_v43, %v3370_v19 }
 0x225   : > { %v1470_v51 = vrot.slane %v1469_v55, 1  ;;  %v1525_v9 = vmax.f32 %v1523_v32, %v1524_v62  ;;  %v1185_v42 = vsel %vm3656_vm4, %v3545_v6, %v1181_v3  ;;  %v955_v24 = vsel %vm3666_vm5, %v3580_v30, %v951_v45  ;;  %1703 = vrot.lane.b32.xlu0 %v3640_v8, %s2142_s17  ;;  %vm3705_vm10 = vmor %vm1032_vm2, %vm1033_vm6 }
 0x226   : > { %v1367_v11 = vsel %vm307_vm0, %v1305_v17, -inf  ;;  %v1304_v47 = vmax.f32 %v1272_v63, 0.0  ;;  %v1312_v37 = vmax.f32 %v1280_v54, 0.0  ;;  %v1031_v21 = vmul.f32 %v3602_v49, %v1030_v38 }
 0x227   : > { %v3682_v44 = vmax.f32 %v1469_v55, %v1470_v51  ;;  %v1526_v15 = vrot.slane %v1525_v9, 1  ;;  %v1368_v29 = vrot.slane %v1367_v11, 4  ;;  %v1296_v34 = vadd.f32 %v3563_v43, %v3466_v27 }
 0x228   : > { %v2074_v19 = vpop.eup %2073  ;;  %v1360_v6 = vsel %vm307_vm0, %v1304_v47, -inf  ;;  %v1289_v30 = vadd.f32 %v3563_v43, %v3506_v50  ;;  %v3691_v52 = vmul.f32 %v1185_v42, %v4037_v13  ;;  %vm1192_vm8 = vweird.f32 %v3635_v25 }
 0x229   : > { %1701 = vrot.lane.b32.xlu1 %v3682_v44, %s2142_s17  ;;  %v3695_v59 = vmax.f32 %v1525_v9, %v1526_v15  ;;  %v1187_v35 = vmul.f32 %v2074_v19, %v3635_v25  ;;  %v1369_v0 = vmax.f32 %v1367_v11, %v1368_v29  ;;  %v1361_v7 = vrot.slane %v1360_v6, 4 }
 0x22a   : > { %v1416_v31 = vsel %vm307_vm0, %v1312_v37, -inf  ;;  %v1328_v27 = vmax.f32 %v1296_v34, 0.0  ;;  %vm1592_vm9 = vcmask 1043459   ;;  %v1203_v50 = vmul.f32 %v955_v24, %v4038_v23  ;;  %v4041_v34 = vld [vmem:[#allocation8_spill] sm:$0xff] }
 0x22b   : > { %1717 = vrot.lane.b32.xlu2 %v3695_v59, %s2142_s17  ;;  %v1188_v1 = vmul.f32 %v2074_v19, %v1187_v35  ;;  %v1417_v57 = vrot.slane %v1416_v31, 4  ;;  %v1321_v5 = vmax.f32 %v1289_v30, 0.0  ;;  %v1035_v26 = vsel %vm3705_vm10, %v3602_v49, %v1031_v21  ;;  %v4042_v35 = vld [vmem:[#allocation9_spill] sm:$0xff] }
 0x22c   : > { %v1370_v53 = vrot.slane %v1369_v0, 2  ;;  %v1362_v60 = vmax.f32 %v1360_v6, %v1361_v7  ;;  %v1528_v3 = vsel %vm307_vm0, %v1328_v27, -inf  ;;  %vm1193_vm11 = vweird.f32 %v2074_v19 }
 0x22d   : > { %v1189_v18 = vmul.f32 0.5, %v1188_v1  ;;  %v1418_v2 = vmax.f32 %v1416_v31, %v1417_v57  ;;  %v1529_v32 = vrot.slane %v1528_v3, 4  ;;  %v1479_v45 = vsel %vm307_vm0, %v1321_v5, -inf  ;;  %vm1194_vm7 = vmor %vm1192_vm8, %vm1193_vm11 }
 0x22e   : > { %v1371_v22 = vmax.f32 %v1369_v0, %v1370_v53  ;;  %v1363_v55 = vrot.slane %v1362_v60, 2  ;;  %v1480_v62 = vrot.slane %v1479_v45, 4  ;;  %v1282_v17 = vadd.f32 %v3563_v43, %v3556_v4 }
 0x22f   : > { %v1190_v28 = vsub.f32 1.5, %v1189_v18  ;;  %v1419_v14 = vrot.slane %v1418_v2, 2  ;;  %v1530_v38 = vmax.f32 %v1528_v3, %v1529_v32  ;;  %v1281_v51 = vadd.f32 %v3563_v43, %v3574_v46 }
 0x230   : > { %v1372_v49 = vrot.slane %v1371_v22, 1  ;;  %v1364_v63 = vmax.f32 %v1362_v60, %v1363_v55  ;;  %v1481_v48 = vmax.f32 %v1479_v45, %v1480_v62  ;;  %v1314_v24 = vmax.f32 %v1282_v17, 0.0 }
 0x231   : > { %v1191_v9 = vmul.f32 %v2074_v19, %v1190_v28  ;;  %v1420_v54 = vmax.f32 %v1418_v2, %v1419_v14  ;;  %v1531_v42 = vrot.slane %v1530_v38, 2  ;;  %v1313_v29 = vmax.f32 %v1281_v51, 0.0 }
 0x232   : > { %v3723_v11 = vmax.f32 %v1371_v22, %v1372_v49  ;;  %v1365_v47 = vrot.slane %v1364_v63, 1  ;;  %v1482_v15 = vrot.slane %v1481_v48, 2  ;;  %v1430_v6 = vsel %vm307_vm0, %v1314_v24, -inf }
 0x233   : > { %v1195_v4 = vsel %vm1194_vm7, %v2074_v19, %v1191_v9  ;;  %v1421_v37 = vrot.slane %v1420_v54, 1  ;;  %v1532_v21 = vmax.f32 %v1530_v38, %v1531_v42  ;;  %v1211_v46 = vmul.f32 %v1035_v26, %v4041_v34  ;;  %v1712_v9 = vpop.permute.xlu2 %1711 }
 0x234   : > { %1673 = vrot.lane.b32.xlu0 %v3723_v11, %s2142_s17  ;;  %v3729_v30 = vmax.f32 %v1364_v63, %v1365_v47  ;;  %v1483_v13 = vmax.f32 %v1481_v48, %v1482_v15  ;;  %v1431_v25 = vrot.slane %v1430_v6, 4  ;;  %v1227_v0 = vmul.f32 %v1195_v4, %v4042_v35 }
 0x235   : > { %v3732_v7 = vmax.f32 %v1420_v54, %v1421_v37  ;;  %v1423_v31 = vsel %vm307_vm0, %v1313_v29, -inf  ;;  %v1274_v19 = vadd.f32 %v3563_v43, %v3583_v16  ;;  %v1254_v27 = vmul.f32 %v3553_v10, %v3650_v12 }
 0x236   : > { %v3742_v23 = vsel %vm1592_vm9, %v3611_v58, %v3587_v36  ;;  %1671 = vrot.lane.b32.xlu1 %v3729_v30, %s2142_s17  ;;  %v1533_v39 = vrot.slane %v1532_v21, 1  ;;  %v1432_v1 = vmax.f32 %v1430_v6, %v1431_v25  ;;  %v3748_v57 = vmul.f32 %v3553_v10, %v3691_v52 }
 0x237   : > { %1687 = vrot.lane.b32.xlu2 %v3732_v7, %s2142_s17  ;;  %v1484_v16 = vrot.slane %v1483_v13, 1  ;;  %v1424_v5 = vrot.slane %v1423_v31, 4  ;;  %v1306_v12 = vmax.f32 %v1274_v19, 0.0  ;;  %v3755_v36 = vsel %vm1592_vm9, %v3618_v56, %v3367_v33 }
 0x238   : > { %v1239_v58 = vmul.f32 %v3553_v10, %v1203_v50  ;;  %v1247_v26 = vmul.f32 %v3553_v10, %v1211_v46  ;;  %v1433_v53 = vrot.slane %v1432_v1, 2  ;;  %v1263_v60 = vmul.f32 %v3553_v10, %v1227_v0 }
 0x239   : > { %v1425_v52 = vmax.f32 %v1423_v31, %v1424_v5  ;;  %v1374_v3 = vsel %vm307_vm0, %v1306_v12, -inf  ;;  %v1291_v18 = vadd.f32 %v3563_v43, %v3646_v41  ;;  %v3763_v2 = vmax.f32 %v1532_v21, %v1533_v39  ;;  %v1664_v12 = vpop.permute.xlu1 %1663 }
 0x23a   : > { %v1434_v32 = vmax.f32 %v1432_v1, %v1433_v53  ;;  %v1375_v45 = vrot.slane %v1374_v3, 4  ;;  %v1290_v33 = vadd.f32 %v3563_v43, %v1254_v27  ;;  %v3766_v56 = vmax.f32 %v1483_v13, %v1484_v16 }
 0x23b   : > { %v1426_v50 = vrot.slane %v1425_v52, 2  ;;  %v1323_v22 = vmax.f32 %v1291_v18, 0.0  ;;  %v1297_v10 = vadd.f32 %v3563_v43, %v3463_v61  ;;  %v1275_v14 = vadd.f32 %v3563_v43, %v1239_v58 }
 0x23c   : > { %v1435_v55 = vrot.slane %v1434_v32, 1  ;;  %v1376_v62 = vmax.f32 %v1374_v3, %v1375_v45  ;;  %v1322_v28 = vmax.f32 %v1290_v33, 0.0  ;;  %v1283_v49 = vadd.f32 %v3563_v43, %v1247_v26 }
 0x23d   : > { %v1427_v41 = vmax.f32 %v1425_v52, %v1426_v50  ;;  %v1493_v38 = vsel %vm307_vm0, %v1323_v22, -inf  ;;  %v1329_v17 = vmax.f32 %v1297_v10, 0.0  ;;  %v1307_v47 = vmax.f32 %v1275_v14, 0.0 }
 0x23e   : > { %1719 = vrot.lane.b32.xlu1 %v3763_v2, %s2142_s17  ;;  %v3775_v63 = vmax.f32 %v1434_v32, %v1435_v55  ;;  %v1377_v48 = vrot.slane %v1376_v62, 2  ;;  %v1494_v51 = vrot.slane %v1493_v38, 4  ;;  %v1486_v61 = vsel %vm307_vm0, %v1322_v28, -inf  ;;  %v1680_v28 = vpop.permute.xlu0 %1679 }
 0x23f   : > { %1705 = vrot.lane.b32.xlu2 %v3766_v56, %s2142_s17  ;;  %v1428_v54 = vrot.slane %v1427_v41, 1  ;;  %v1487_v42 = vrot.slane %v1486_v61, 4  ;;  %v1535_v24 = vsel %vm307_vm0, %v1329_v17, -inf  ;;  %v1315_v37 = vmax.f32 %v1283_v49, 0.0 }
 0x240   : > { %1691 = vrot.lane.b32.xlu0 %v3775_v63, %s2142_s17  ;;  %v1378_v15 = vmax.f32 %v1376_v62, %v1377_v48  ;;  %v1495_v29 = vmax.f32 %v1493_v38, %v1494_v51  ;;  %v1536_v4 = vrot.slane %v1535_v24, 4  ;;  %v1381_v34 = vsel %vm307_vm0, %v1307_v47, -inf }
 0x241   : > { %v3784_v21 = vmax.f32 %v1427_v41, %v1428_v54  ;;  %v1488_v6 = vmax.f32 %v1486_v61, %v1487_v42  ;;  %v1299_v46 = vadd.f32 %v3563_v43, %v1263_v60  ;;  %v1382_v0 = vrot.slane %v1381_v34, 4 }
 0x242   : > { %v1379_v13 = vrot.slane %v1378_v15, 1  ;;  %v1496_v25 = vrot.slane %v1495_v29, 2  ;;  %v1537_v35 = vmax.f32 %v1535_v24, %v1536_v4  ;;  %vm1594_vm12 = vcmask 1044484  }
 0x243   : > { %v1489_v31 = vrot.slane %v1488_v6, 2  ;;  %v1437_v19 = vsel %vm307_vm0, %v1315_v37, -inf  ;;  %v1331_v27 = vmax.f32 %v1299_v46, 0.0  ;;  %v1383_v5 = vmax.f32 %v1381_v34, %v1382_v0 }
 0x244   : > { %v1380_v39 = vmax.f32 %v1378_v15, %v1379_v13  ;;  %v1497_v1 = vmax.f32 %v1495_v29, %v1496_v25  ;;  %v1538_v16 = vrot.slane %v1537_v35, 2  ;;  %v1611_v58 = vsel %vm1592_vm9, %v3682_v44, %v3501_v40 }
 0x245   : > { %v1490_v26 = vmax.f32 %v1488_v6, %v1489_v31  ;;  %v1438_v53 = vrot.slane %v1437_v19, 4  ;;  %v1549_v60 = vsel %vm307_vm0, %v1331_v27, -inf  ;;  %v1595_v52 = vsel %vm1594_vm12, %v3729_v30, %v3755_v36 }
 0x246   : > { %vm1596_vm3 = vcmask 1045509   ;;  %1689 = vrot.lane.b32.xlu1 %v3784_v21, %s2142_s17  ;;  %v1498_v3 = vrot.slane %v1497_v1, 1  ;;  %v1384_v18 = vrot.slane %v1383_v5, 2  ;;  %v1550_v32 = vrot.slane %v1549_v60, 4  ;;  %v1666_v33 = vpop.permute.xlu2 %1665 }
 0x247   : > { %1675 = vrot.lane.b32.xlu2 %v1380_v39, %s2142_s17  ;;  %v1491_v40 = vrot.slane %v1490_v26, 1  ;;  %v1439_v44 = vmax.f32 %v1437_v19, %v1438_v53  ;;  %v1298_v45 = vadd.f32 %v3563_v43, %v3748_v57  ;;  %v1539_v30 = vmax.f32 %v1537_v35, %v1538_v16 }
 0x248   : > { %v1499_v50 = vmax.f32 %v1497_v1, %v1498_v3  ;;  %v1385_v36 = vmax.f32 %v1383_v5, %v1384_v18  ;;  %vm1759_vm13 = vcmask 523520   ;;  %v1612_v22 = vsel %vm1594_vm12, %v3640_v8, %v1611_v58 }
 0x249   : > { %v1440_v10 = vrot.slane %v1439_v44, 2  ;;  %v1551_v55 = vmax.f32 %v1549_v60, %v1550_v32  ;;  %v1330_v62 = vmax.f32 %v1298_v45, 0.0  ;;  %1784 = vst.msk [vmem:[%s2252_s9 + $0xc0] sm:$0xff] %vm1759_vm13, %v1712_v9  ;;  %v1605_v43 = vsel %vm1594_vm12, %v3732_v7, %v3742_v23 }
 0x24a   : > { %vm1598_vm14 = vcmask 1046534   ;;  %1709 = vrot.lane.b32.xlu0 %v1499_v50, %s2142_s17  ;;  %v1492_v57 = vmax.f32 %v1490_v26, %v1491_v40  ;;  %v1386_v14 = vrot.slane %v1385_v36, 1  ;;  %1761 = vst.msk [vmem:[%s2252_s9 + $0x8] sm:$0xff] %vm1759_vm13, %v1666_v33  ;;  %v1597_v8 = vsel %vm1596_vm3, %v3723_v11, %v1595_v52 }
 0x24b   : > { %v1441_v41 = vmax.f32 %v1439_v44, %v1440_v10  ;;  %v1552_v38 = vrot.slane %v1551_v55, 2  ;;  %v1542_v17 = vsel %vm307_vm0, %v1330_v62, -inf  ;;  %1760 = vst.msk [vmem:[%s2252_s9] sm:$0xff] %vm1759_vm13, %v1664_v12  ;;  %vm1600_vm15 = vcmask 1047559  }
 0x24c   : > { %v1540_v49 = vrot.slane %v1539_v30, 1  ;;  %v1387_v7 = vmax.f32 %v1385_v36, %v1386_v14  ;;  %v1543_v23 = vrot.slane %v1542_v17, 4  ;;  %1768 = vst.msk [vmem:[%s2252_s9 + $0x40] sm:$0xff] %vm1759_vm13, %v1680_v28  ;;  %v1606_v11 = vsel %vm1596_vm3, %v3784_v21, %v1605_v43  ;;  %v1696_v24 = vpop.permute.xlu1 %1695 }
 0x24d   : > { %v1599_v48 = vsel %vm1598_vm14, %v1380_v39, %v1597_v8  ;;  %v1442_v51 = vrot.slane %v1441_v41, 1  ;;  %v1553_v61 = vmax.f32 %v1551_v55, %v1552_v38  ;;  %v1613_v9 = vsel %vm1596_vm3, %v3766_v56, %v1612_v22  ;;  %1776 = vst.msk [vmem:[%s2252_s9 + $0x80] sm:$0xff] %vm1759_vm13, %v1696_v24 }
 0x24e   : > { %1707 = vrot.lane.b32.xlu1 %v1492_v57, %s2142_s17  ;;  %v1601_v54 = vsel %vm1600_vm15, %v1387_v7, %v1599_v48  ;;  %v1544_v42 = vmax.f32 %v1542_v17, %v1543_v23  ;;  %v1614_v47 = vsel %vm1598_vm14, %v1492_v57, %v1613_v9  ;;  %v1541_v29 = vmax.f32 %v1539_v30, %v1540_v49 }
 0x24f   : > { %1627 = vst.msk [vmem:[%s3832_s13] sm:$0xff] %vm307_vm0, %v1601_v54  ;;  %v1443_v15 = vmax.f32 %v1441_v41, %v1442_v51  ;;  %v1607_v4 = vsel %vm1598_vm14, %v3775_v63, %v1606_v11  ;;  %v1554_v21 = vrot.slane %v1553_v61, 1  ;;  %v1615_v6 = vsel %vm1600_vm15, %v1499_v50, %v1614_v47 }
 0x250   : > { %v1545_v37 = vrot.slane %v1544_v42, 2  ;;  %v1618_v63 = vsel %vm1592_vm9, %v3695_v59, %v3493_v20  ;;  %1629 = vst.msk [vmem:[%s3832_s13 + $0x10] sm:$0xff] %vm307_vm0, %v1615_v6 }
 0x251   : > { %1693 = vrot.lane.b32.xlu2 %v1443_v15, %s2142_s17  ;;  %v1608_v56 = vsel %vm1600_vm15, %v1443_v15, %v1607_v4  ;;  %v1619_v13 = vsel %vm1594_vm12, %v3763_v2, %v1618_v63  ;;  %v1555_v35 = vmax.f32 %v1553_v61, %v1554_v21 }
 0x252   : > { %1721 = vrot.lane.b32.xlu0 %v1541_v29, %s2142_s17  ;;  %1628 = vst.msk [vmem:[%s3832_s13 + $0x8] sm:$0xff] %vm307_vm0, %v1608_v56  ;;  %v1546_v34 = vmax.f32 %v1544_v42, %v1545_v37  ;;  %v1682_v46 = vpop.permute.xlu2 %1681  ;;  %v1620_v31 = vsel %vm1596_vm3, %v1541_v29, %v1619_v13 }
 0x253   : > { %1769 = vst.msk [vmem:[%s2252_s9 + $0x48] sm:$0xff] %vm1759_vm13, %v1682_v46 }
 0x254   : > { %v1547_v25 = vrot.slane %v1546_v34, 1 }
 0x256   : > { %1677 = vrot.lane.b32.xlu1 %v1387_v7, %s2142_s17  ;;  %v1548_v0 = vmax.f32 %v1546_v34, %v1547_v25 }
 0x258   : > { %v1621_v20 = vsel %vm1598_vm14, %v1548_v0, %v1620_v31 }
 0x259   : > { %1723 = vrot.lane.b32.xlu2 %v1548_v0, %s2142_s17  ;;  %v1622_v59 = vsel %vm1600_vm15, %v1555_v35, %v1621_v20  ;;  %v1698_v2 = vpop.permute.xlu0 %1697 }
 0x25a   : > { %1630 = vst.msk [vmem:[%s3832_s13 + $0x18] sm:$0xff] %vm307_vm0, %v1622_v59 }
 0x25b   : > { %1777 = vst.msk [vmem:[%s2252_s9 + $0x88] sm:$0xff] %vm1759_vm13, %v1698_v2 }
 0x25e   : > { %1725 = vrot.lane.b32.xlu1 %v1555_v35, %s2142_s17 }
 0x265   : > { %v1700_v19 = vpop.permute.xlu2 %1699 }
 0x266   : > { %1778 = vst.msk [vmem:[%s2252_s9 + $0x90] sm:$0xff] %vm1759_vm13, %v1700_v19 }
 0x268   : > { %v1668_v27 = vpop.permute.xlu0 %1667 }
 0x269   : > { %1762 = vst.msk [vmem:[%s2252_s9 + $0x10] sm:$0xff] %vm1759_vm13, %v1668_v27 }
 0x26d   : > { %v1714_v39 = vpop.permute.xlu1 %1713 }
 0x26e   : > { %1785 = vst.msk [vmem:[%s2252_s9 + $0xc8] sm:$0xff] %vm1759_vm13, %v1714_v39 }
 0x27a   : > { %v1670_v1 = vpop.permute.xlu2 %1669 }
 0x27b   : > { %1763 = vst.msk [vmem:[%s2252_s9 + $0x18] sm:$0xff] %vm1759_vm13, %v1670_v1 }
 0x27c   : > { %v1716_v16 = vpop.permute.xlu0 %1715 }
 0x27d   : > { %1786 = vst.msk [vmem:[%s2252_s9 + $0xd0] sm:$0xff] %vm1759_vm13, %v1716_v16 }
 0x27f   : > { %v1684_v5 = vpop.permute.xlu1 %1683 }
 0x280   : > { %1770 = vst.msk [vmem:[%s2252_s9 + $0x50] sm:$0xff] %vm1759_vm13, %v1684_v5 }
 0x285   : > { %v1718_v12 = vpop.permute.xlu2 %1717 }
 0x286   : > { %1787 = vst.msk [vmem:[%s2252_s9 + $0xd8] sm:$0xff] %vm1759_vm13, %v1718_v12 }
 0x28f   : > { %v1686_v58 = vpop.permute.xlu0 %1685 }
 0x290   : > { %1771 = vst.msk [vmem:[%s2252_s9 + $0x58] sm:$0xff] %vm1759_vm13, %v1686_v58 }
 0x291   : > { %v1688_v26 = vpop.permute.xlu2 %1687 }
 0x292   : > { %1772 = vst.msk [vmem:[%s2252_s9 + $0x60] sm:$0xff] %vm1759_vm13, %v1688_v26 }
 0x297   : > { %v1704_v53 = vpop.permute.xlu0 %1703 }
 0x298   : > { %1780 = vst.msk [vmem:[%s2252_s9 + $0xa0] sm:$0xff] %vm1759_vm13, %v1704_v53 }
 0x299   : > { %v1706_v60 = vpop.permute.xlu2 %1705 }
 0x29a   : > { %1781 = vst.msk [vmem:[%s2252_s9 + $0xa8] sm:$0xff] %vm1759_vm13, %v1706_v60 }
 0x29b   : > { %v1702_v52 = vpop.permute.xlu1 %1701 }
 0x29c   : > { %1779 = vst.msk [vmem:[%s2252_s9 + $0x98] sm:$0xff] %vm1759_vm13, %v1702_v52 }
 0x2a1   : > { %v1676_v3 = vpop.permute.xlu2 %1675 }
 0x2a2   : > { %1766 = vst.msk [vmem:[%s2252_s9 + $0x30] sm:$0xff] %vm1759_vm13, %v1676_v3 }
 0x2a6   : > { %v1674_v18 = vpop.permute.xlu0 %1673 }
 0x2a7   : > { %1765 = vst.msk [vmem:[%s2252_s9 + $0x28] sm:$0xff] %vm1759_vm13, %v1674_v18 }
 0x2a8   : > { %v1672_v40 = vpop.permute.xlu1 %1671 }
 0x2a9   : > { %1764 = vst.msk [vmem:[%s2252_s9 + $0x20] sm:$0xff] %vm1759_vm13, %v1672_v40 }
 0x2ab   : > { %v1694_v44 = vpop.permute.xlu2 %1693 }
 0x2ac   : > { %1775 = vst.msk [vmem:[%s2252_s9 + $0x78] sm:$0xff] %vm1759_vm13, %v1694_v44 }
 0x2b0   : > { %v1720_v32 = vpop.permute.xlu1 %1719 }
 0x2b1   : > { %1788 = vst.msk [vmem:[%s2252_s9 + $0xe0] sm:$0xff] %vm1759_vm13, %v1720_v32 }
 0x2b2   : > { %v1692_v45 = vpop.permute.xlu0 %1691 }
 0x2b3   : > { %1774 = vst.msk [vmem:[%s2252_s9 + $0x70] sm:$0xff] %vm1759_vm13, %v1692_v45  ;;  %v1724_v33 = vpop.permute.xlu2 %1723 }
 0x2b4   : > { %1790 = vst.msk [vmem:[%s2252_s9 + $0xf0] sm:$0xff] %vm1759_vm13, %v1724_v33 }
 0x2b8   : > { %v1690_v50 = vpop.permute.xlu1 %1689 }
 0x2b9   : > { %1773 = vst.msk [vmem:[%s2252_s9 + $0x68] sm:$0xff] %vm1759_vm13, %v1690_v50 }
 0x2bc   : > { %v1710_v30 = vpop.permute.xlu0 %1709 }
 0x2bd   : > { %1783 = vst.msk [vmem:[%s2252_s9 + $0xb8] sm:$0xff] %vm1759_vm13, %v1710_v30 }
 0x2c0   : > { %v1708_v36 = vpop.permute.xlu1 %1707 }
 0x2c1   : > { %1782 = vst.msk [vmem:[%s2252_s9 + $0xb0] sm:$0xff] %vm1759_vm13, %v1708_v36 }
 0x2c4   : > { %v1722_v22 = vpop.permute.xlu0 %1721 }
 0x2c5   : > { %1789 = vst.msk [vmem:[%s2252_s9 + $0xe8] sm:$0xff] %vm1759_vm13, %v1722_v22 }
 0x2c8   : > { %v1678_v10 = vpop.permute.xlu1 %1677 }
 0x2c9   : > { %1767 = vst.msk [vmem:[%s2252_s9 + $0x38] sm:$0xff] %vm1759_vm13, %v1678_v10 }
 0x2d0   : > { %v1726_v55 = vpop.permute.xlu1 %1725 }
 0x2d1   : > { %1791 = vst.msk [vmem:[%s2252_s9 + $0xf8] sm:$0xff] %vm1759_vm13, %v1726_v55 }
 0x2d2   : > { %2104 = shalt.err (!%p2101_p4)
}
 0x2d3   : > { %s2143_s14 = smov 128   ;;  %s2144_s9 = smov 8  }
 0x2d4   : > { %1963 = dma.vmem_to_hbm [thread:$0]  (%p2218_p5), %s1811_s19, 4096, %s1813_s20, %s1793_s26, %s2143_s14, %s2143_s14, %s2144_s9  }
 0x2d5 PF: > { %p1969_p7 = scmp.ge.s32.totalorder %s2139_s24, 2  ;;  %s1831_s15 = sand.u32 1, %s2127_s21  }
 0x2d6   : > { %s1832_s16 = scalar_lea.sflag [#allocation3], %s1831_s15 }
 0x2d7   : > { %p1966_p8 = pnand %p1969_p7, %p2222_p6 }
 0x2d9   : > { %p1967_p9 = pneg %p1966_p8 }
 0x2db   : > { %2122 = dma.done.wait (%p1967_p9), %s1832_s16, 4096  }
 0x2dc   : > { %2124 = vsyncadd (%p1967_p9), %s1832_s16, 4294963200  ;;  %p17_p10 = scmp.ge.s32.totalorder %s2205_s27, 4   ;;  %s4044_s21 = smov %s2131_s22 }
 0x2dd   : > { %s4045_s22 = smov %s2135_s23  ;;  %s4046_s23 = smov %s2216_s30 }
 0x2de   : > { %s4047_s24 = smov %s2205_s27  ;;  %19 = sbr.rel (!%p17_p10) target bundleno = 3 (0x3), region = 87 }
 0x2e3   :  { %1846 = vsyncpa [#allocation3], 1 }
 0x2e4   :  { %1848 = vsyncpa [#allocation3 + $0x1], 1 }

</bundles_post_ra>
